<compile_context>
chip_gen: v7x
topology: tpu7x:2x2x1
jax: 0.10.0
libtpu: 0.0.40
codegen_flags: <defaults>
</compile_context>

<pallas_src>
import math

import jax
import jax.numpy as jnp
import numpy as np
from jax import lax
from jax.experimental import pallas as pl
from jax.experimental.pallas import tpu as pltpu


# ----------------------------------------------------------------------------
# tiling heuristics
# ----------------------------------------------------------------------------
def _pick_q_tile(seq_len):
    """Query-row tile: whole sequence when short, else 512/256/128 rows so the
    per-step (Sq, S) intermediates + double-buffered attn block fit VMEM."""
    if seq_len <= 512:
        return seq_len
    for t in (512, 256, 128):
        if seq_len % t == 0:
            return t
    return seq_len  # TODO(synk): pad ragged sequence lengths in production.


def _pick_head_group(num_heads, head_dim, requested=None):
    """Heads per grid step so G*head_dim ~ 128 lanes (MXU-friendly on all
    generations; raise the target to 256 on v6e/v7x when VMEM allows)."""
    g = int(requested) if requested is not None else max(1, 128 // head_dim)
    g = max(1, min(g, num_heads))
    while num_heads % g:
        g -= 1
    return g


# ----------------------------------------------------------------------------
# Pallas kernel factory: one program per (batch, q-tile, head-group)
# ----------------------------------------------------------------------------
def make_attention_kernel(seq_len, q_tile, head_dim, group_size, band, has_bias,
                          self_attn):
    hd, G = head_dim, group_size
    ghd = G * hd
    n_q_tiles = seq_len // q_tile

    def _compute(x_q, x_k, x_v, wq_ref, bq_ref, wk_ref, bk_ref, wv_ref, bv_ref,
                 wo_ref, bo_ref, bias_ref, out_ref, attn_ref, acc_ref):
        qi = pl.program_id(1)
        g = pl.program_id(2)
        n_groups = pl.num_programs(2)

        # Head-group QKV projections: bf16 x bf16 on the MXU, f32 accumulation.
        # (1/sqrt(head_dim) is already folded into wq/bq by the wrapper.)
        q_g = jnp.dot(x_q, wq_ref[g], preferred_element_type=jnp.float32) + bq_ref[g]
        k_g = jnp.dot(x_k, wk_ref[g], preferred_element_type=jnp.float32) + bk_ref[g]
        v_g = jnp.dot(x_v, wv_ref[g], preferred_element_type=jnp.float32) + bv_ref[g]

        # Additive mask bits, shared by every head in the group (hoisted).
        keep = None
        if band is not None:
            window, global_tokens = band
            half = window // 2
            row = qi * q_tile + lax.broadcasted_iota(jnp.int32, (q_tile, seq_len), 0)
            col = lax.broadcasted_iota(jnp.int32, (q_tile, seq_len), 1)
            keep = (((col >= row - half) & (col <= row + half))
                    | (row < global_tokens) | (col < global_tokens))
        bias = bias_ref[...].astype(jnp.float32) if has_bias else None

        # Per-head scores / softmax / context.  G is small (1-4): static unroll.
        ctx_parts = []
        for hh in range(G):
            sl = slice(hh * hd, (hh + 1) * hd)
            s = lax.dot_general(
                q_g[:, sl].astype(jnp.bfloat16), k_g[:, sl].astype(jnp.bfloat16),
                (((1,), (1,)), ((), ())),
                preferred_element_type=jnp.float32)              # (q_tile, S)
            if keep is not None:
                s = jnp.where(keep, s, jnp.float32(-1e9))
            if bias is not None:
                s = s + bias
            s = s - jnp.max(s, axis=-1, keepdims=True)
            e = jnp.exp(s)
            attn = e * pl.reciprocal(jnp.sum(e, axis=-1, keepdims=True), approx=True)
            attn_ref[0, hh] = attn.astype(attn_ref.dtype)
            ctx_parts.append(jnp.dot(attn.astype(jnp.bfloat16),
                                     v_g[:, sl].astype(jnp.bfloat16),
                                     preferred_element_type=jnp.float32))
        ctx_g = ctx_parts[0] if G == 1 else jnp.concatenate(ctx_parts, axis=1)

        # Fused O-projection slice for this head group: contraction K = G*hd
        # against the resident (D, D) Wo slab (dynamic sublane row-slice).
        if ghd == wo_ref.shape[0]:
            wo_rows = wo_ref[...]
        else:
            wo_rows = wo_ref[pl.ds(pl.multiple_of(g * ghd, ghd), ghd), :]
        part = jnp.dot(ctx_g.astype(jnp.bfloat16), wo_rows,
                       preferred_element_type=jnp.float32)        # (q_tile, D)

        @pl.when(g == 0)
        def _():
            acc_ref[...] = jnp.zeros_like(acc_ref)

        acc_ref[...] += part

        @pl.when(g == n_groups - 1)
        def _():
            out_ref[0] = acc_ref[...] + bo_ref[...]

    if self_attn:
        def kernel(x_ref, wq_ref, bq_ref, wk_ref, bk_ref, wv_ref, bv_ref,
                   wo_ref, bo_ref, *rest):
            bias_ref = rest[0] if has_bias else None
            out_ref, attn_ref, acc_ref = rest[-3:]
            x_full = x_ref[0]                                     # (S, D) bf16
            if n_q_tiles == 1:
                x_q = x_full
            else:
                qi = pl.program_id(1)
                start = pl.multiple_of(qi * q_tile, q_tile)
                x_q = x_ref[0, pl.ds(start, q_tile), :]
            _compute(x_q, x_full, x_full, wq_ref, bq_ref, wk_ref, bk_ref,
                     wv_ref, bv_ref, wo_ref, bo_ref, bias_ref,
                     out_ref, attn_ref, acc_ref)
        return kernel

    def kernel(xq_ref, xk_ref, xv_ref, wq_ref, bq_ref, wk_ref, bk_ref,
               wv_ref, bv_ref, wo_ref, bo_ref, *rest):
        bias_ref = rest[0] if has_bias else None
        out_ref, attn_ref, acc_ref = rest[-3:]
        _compute(xq_ref[0], xk_ref[0], xv_ref[0], wq_ref, bq_ref, wk_ref, bk_ref,
                 wv_ref, bv_ref, wo_ref, bo_ref, bias_ref,
                 out_ref, attn_ref, acc_ref)
    return kernel


# ----------------------------------------------------------------------------
# mask helpers
# ----------------------------------------------------------------------------
def build_sparse_mask(seq_len, window_size, global_tokens):
    i = jnp.arange(seq_len)[:, None]
    j = jnp.arange(seq_len)[None, :]
    band = (j >= i - window_size // 2) & (j <= i + window_size // 2)
    m = band.astype(jnp.float32)
    m = m.at[:global_tokens, :].set(1.0)
    m = m.at[:, :global_tokens].set(1.0)
    return m


def _as_2d_mask(mask, seq_len):
    m = jnp.asarray(mask, jnp.float32)
    while m.ndim > 2:
        assert m.shape[0] == 1, "kernel supports only (seq, seq)-broadcastable masks"
        m = m[0]
    assert m.shape == (seq_len, seq_len)
    return m


# ----------------------------------------------------------------------------
# module wrapper
# ----------------------------------------------------------------------------
class EnhancedAttentionPallas:
    def __init__(self, d_model, num_heads, dropout=0.1, use_sparse_attention=True,
                 attn_dtype=jnp.bfloat16, heads_per_step=None, key=None):
        assert d_model % num_heads == 0
        self.d_model = d_model
        self.num_heads = num_heads
        self.head_dim = d_model // num_heads
        self.use_sparse_attention = use_sparse_attention
        self.attn_dtype = attn_dtype          # bf16 halves the dominant S^2 writeback
        self.heads_per_step = heads_per_step
        if use_sparse_attention:
            self.sparse_block_size = 64
            self.global_tokens = 16

        if key is None:
            key = jax.random.PRNGKey(0)
        keys = jax.random.split(key, 8)
        bound = 1.0 / math.sqrt(d_model)      # PyTorch nn.Linear default init

        def linear_params(kw, kb):
            w = jax.random.uniform(kw, (d_model, d_model), jnp.float32, -bound, bound)
            b = jax.random.uniform(kb, (d_model,), jnp.float32, -bound, bound)
            return w, b                        # stored PyTorch-style (out, in)

        self.wq, self.bq = linear_params(keys[0], keys[1])
        self.wk, self.bk = linear_params(keys[2], keys[3])
        self.wv, self.bv = linear_params(keys[4], keys[5])
        self.wo, self.bo = linear_params(keys[6], keys[7])

    # ------------------------------------------------------------------
    def __call__(self, query, key, value, mask=None, attention_window=None):
        B, S, D = query.shape
        assert D == self.d_model
        self_attn = (query is key) and (key is value)

        band = None       # static (window, global) -> mask built in-kernel
        bias = None       # additive (S, S) mask bias shipped to kernel (bf16)
        if self.use_sparse_attention and S > self.sparse_block_size:
            window_size = attention_window or self.sparse_block_size
            if mask is None:
                band = (int(window_size), int(self.global_tokens))
            else:
                combined = _as_2d_mask(mask, S) * build_sparse_mask(
                    S, window_size, self.global_tokens)
                bias = jnp.where(combined == 0.0, jnp.float32(-1e9), jnp.float32(0.0))
        elif mask is not None:
            bias = jnp.where(_as_2d_mask(mask, S) == 0.0,
                             jnp.float32(-1e9), jnp.float32(0.0))

        return self._attention_pallas(query, key, value, band, bias, self_attn)

    # ------------------------------------------------------------------
    def _attention_pallas(self, xq, xk, xv, band, bias, self_attn):
        B, S, D = xq.shape
        H, hd = self.num_heads, self.head_dim
        G = _pick_head_group(H, hd, self.heads_per_step)
        nG = H // G
        ghd = G * hd
        Sq = _pick_q_tile(S)
        nQ = S // Sq

        bf16 = jnp.bfloat16
        scale = 1.0 / math.sqrt(hd)

        # Grouped, MXU-ready weight slabs.  Constant index maps make them
        # resident for the whole launch (fetched once, not per grid step).
        def group_w(w, fold_scale=False):
            wt = w.T * scale if fold_scale else w.T              # (D_in, D_out)
            return wt.reshape(D, nG, ghd).transpose(1, 0, 2).astype(bf16)

        wq_g = group_w(self.wq, fold_scale=True)                 # (nG, D, G*hd)
        wk_g = group_w(self.wk)
        wv_g = group_w(self.wv)
        wo_t = self.wo.T.astype(bf16)                            # (D, D)
        bq_g = (self.bq * scale).reshape(nG, 1, ghd)
        bk_g = self.bk.reshape(nG, 1, ghd)
        bv_g = self.bv.reshape(nG, 1, ghd)
        bo_2 = self.bo.reshape(1, D)

        kernel = make_attention_kernel(S, Sq, hd, G, band, bias is not None,
                                       self_attn)

        w_spec = pl.BlockSpec((nG, D, ghd), lambda b, qi, g: (0, 0, 0))
        bw_spec = pl.BlockSpec((nG, 1, ghd), lambda b, qi, g: (0, 0, 0))
        wo_spec = pl.BlockSpec((D, D), lambda b, qi, g: (0, 0))
        bo_spec = pl.BlockSpec((1, D), lambda b, qi, g: (0, 0))
        weight_specs = [w_spec, bw_spec, w_spec, bw_spec, w_spec, bw_spec,
                        wo_spec, bo_spec]
        weight_args = [wq_g, bq_g, wk_g, bk_g, wv_g, bv_g, wo_t, bo_2]

        if self_attn:
            # Single shared activation: 3x less HBM DMA / VMEM than 3 copies.
            x_specs = [pl.BlockSpec((1, S, D), lambda b, qi, g: (b, 0, 0))]
            x_args = [xq.astype(bf16)]
        else:
            x_specs = [pl.BlockSpec((1, Sq, D), lambda b, qi, g: (b, qi, 0)),
                       pl.BlockSpec((1, S, D), lambda b, qi, g: (b, 0, 0)),
                       pl.BlockSpec((1, S, D), lambda b, qi, g: (b, 0, 0))]
            x_args = [xq.astype(bf16), xk.astype(bf16), xv.astype(bf16)]

        in_specs = x_specs + weight_specs
        args = x_args + weight_args
        if bias is not None:
            in_specs.append(pl.BlockSpec((Sq, S), lambda b, qi, g: (qi, 0)))
            args.append(bias.astype(bf16))

        out, attn = pl.pallas_call(
            kernel,
            grid=(B, nQ, nG),
            in_specs=in_specs,
            out_specs=(
                pl.BlockSpec((1, Sq, D), lambda b, qi, g: (b, qi, 0)),
                pl.BlockSpec((1, G, Sq, S), lambda b, qi, g: (b, g, qi, 0)),
            ),
            out_shape=(
                jax.ShapeDtypeStruct((B, S, D), jnp.float32),
                jax.ShapeDtypeStruct((B, H, S, S), self.attn_dtype),
            ),
            scratch_shapes=[pltpu.VMEM((Sq, D), jnp.float32)],
            compiler_params=pltpu.CompilerParams(
                dimension_semantics=("parallel", "parallel", "arbitrary")),
        )(*args)
        return out, attn


# ----------------------------------------------------------------------------
# Pure-JAX reference (mirrors the PyTorch forward exactly, f32 throughout)
# ----------------------------------------------------------------------------
def reference_forward(mod, query, key, value, mask=None, attention_window=None):
    B, S, D = query.shape
    H, hd = mod.num_heads, mod.head_dim
    P = jax.lax.Precision.HIGHEST

    def lin(x, w, b):
        return jnp.matmul(x, w.T, precision=P) + b

    q = lin(query, mod.wq, mod.bq).reshape(B, S, H, hd).transpose(0, 2, 1, 3)
    k = lin(key, mod.wk, mod.bk).reshape(B, S, H, hd).transpose(0, 2, 1, 3)
    v = lin(value, mod.wv, mod.bv).reshape(B, S, H, hd).transpose(0, 2, 1, 3)

    scores = jnp.matmul(q, k.transpose(0, 1, 3, 2), precision=P) / math.sqrt(hd)

    if mod.use_sparse_attention and S > mod.sparse_block_size:
        window_size = attention_window or mod.sparse_block_size
        sparse_mask = np.zeros((S, S), np.float32)
        for i in range(S):  # literal copy of the PyTorch loop
            ws = max(0, i - window_size // 2)
            we = min(S, i + window_size // 2 + 1)
            sparse_mask[i, ws:we] = 1
        sparse_mask[:mod.global_tokens, :] = 1
        sparse_mask[:, :mod.global_tokens] = 1
        combined = sparse_mask[None, None] if mask is None else mask * sparse_mask[None, None]
        scores = jnp.where(combined == 0, -1e9, scores)
    elif mask is not None:
        scores = jnp.where(mask == 0, -1e9, scores)

    attn = jax.nn.softmax(scores, axis=-1)
    out = jnp.matmul(attn, v, precision=P)
    out = out.transpose(0, 2, 1, 3).reshape(B, S, D)
    out = lin(out, mod.wo, mod.bo)
    return out, attn


def _np32(a):
    return np.asarray(jnp.asarray(a, jnp.float32))


# ----------------------------------------------------------------------------
if __name__ == "__main__":
    root = jax.random.PRNGKey(0)
    kq, kk, kv, kparam, kq2 = jax.random.split(root, 5)

    B, S, D, H = 2, 8, 32, 4
    mod = EnhancedAttentionPallas(D, H, key=kparam)

    q = jax.random.normal(kq, (B, S, D), jnp.float32)
    k = jax.random.normal(kk, (B, S, D), jnp.float32)
    v = jax.random.normal(kv, (B, S, D), jnp.float32)

    def check(got, ref):
        np.testing.assert_allclose(_np32(got[0]), _np32(ref[0]), rtol=2e-2, atol=2e-2)
        np.testing.assert_allclose(_np32(got[1]), _np32(ref[1]), rtol=2e-2, atol=2e-2)

    # --- 1) standard path (cross-attention inputs), no mask ---
    res = mod(q, k, v)
    jax.block_until_ready(res)
    check(res, reference_forward(mod, q, k, v))

    # --- 2) standard path with a user (S,S) mask (additive-bias kernel path) ---
    causal = (jnp.arange(S)[None, :] <= jnp.arange(S)[:, None]).astype(jnp.float32)
    res_m = mod(q, k, v, mask=causal)
    jax.block_until_ready(res_m)
    check(res_m, reference_forward(mod, q, k, v, mask=causal))

    # --- 3) sparse path (seq > 64), self-attention: band mask built in-kernel ---
    S2 = 80
    q2 = jax.random.normal(kq2, (B, S2, D), jnp.float32)
    res2 = mod(q2, q2, q2)
    jax.block_until_ready(res2)
    check(res2, reference_forward(mod, q2, q2, q2))

    # --- 4) sparse path + user mask + explicit attention_window ---
    causal2 = (jnp.arange(S2)[None, :] <= jnp.arange(S2)[:, None]).astype(jnp.float32)
    res3 = mod(q2, q2, q2, mask=causal2, attention_window=32)
    jax.block_until_ready(res3)
    check(res3, reference_forward(mod, q2, q2, q2, mask=causal2, attention_window=32))

    # --- 5) multi head-group path (nG > 1): exercises the group accumulator
    #        and the dynamic Wo row-slice used at production head counts ---
    mod2 = EnhancedAttentionPallas(D, H, key=kparam, heads_per_step=2)
    res5 = mod2(q, k, v)
    jax.block_until_ready(res5)
    check(res5, reference_forward(mod2, q, k, v))

    print("KERNEL_OK")
</pallas_src>

<mosaic_0001>
module attributes {stable_mosaic.version = 11 : i64} {
  func.func @kernel(%arg0: i32, %arg1: i32, %arg2: i32, %arg3: memref<1x8x32xbf16, #tpu.memory_space<vmem>>, %arg4: memref<1x8x32xbf16, #tpu.memory_space<vmem>>, %arg5: memref<1x8x32xbf16, #tpu.memory_space<vmem>>, %arg6: memref<1x32x32xbf16, #tpu.memory_space<vmem>>, %arg7: memref<1x1x32xf32, #tpu.memory_space<vmem>>, %arg8: memref<1x32x32xbf16, #tpu.memory_space<vmem>>, %arg9: memref<1x1x32xf32, #tpu.memory_space<vmem>>, %arg10: memref<1x32x32xbf16, #tpu.memory_space<vmem>>, %arg11: memref<1x1x32xf32, #tpu.memory_space<vmem>>, %arg12: memref<32x32xbf16, #tpu.memory_space<vmem>>, %arg13: memref<1x32xf32, #tpu.memory_space<vmem>>, %arg14: memref<1x8x32xf32, #tpu.memory_space<vmem>>, %arg15: memref<1x4x8x8xbf16, #tpu.memory_space<vmem>>, %arg16: memref<8x32xf32, #tpu.memory_space<vmem>>) attributes {dimension_semantics = [#tpu.dimension_semantics<parallel>, #tpu.dimension_semantics<parallel>, #tpu.dimension_semantics<arbitrary>], iteration_bounds = array<i64: 2, 1, 1>, scalar_prefetch = 0 : i64, scratch_operands = 1 : i64, tpu.core_type = #tpu.core_type<tc>, window_params = [{transform_indices = @transform_0, window_bounds = array<i64: 1, 8, 32>}, {transform_indices = @transform_1, window_bounds = array<i64: 1, 8, 32>}, {transform_indices = @transform_2, window_bounds = array<i64: 1, 8, 32>}, {pipeline_mode = #tpu.pipeline_mode<synchronous>, transform_indices = @transform_3, window_bounds = array<i64: 1, 32, 32>}, {pipeline_mode = #tpu.pipeline_mode<synchronous>, transform_indices = @transform_4, window_bounds = array<i64: 1, 1, 32>}, {pipeline_mode = #tpu.pipeline_mode<synchronous>, transform_indices = @transform_5, window_bounds = array<i64: 1, 32, 32>}, {pipeline_mode = #tpu.pipeline_mode<synchronous>, transform_indices = @transform_6, window_bounds = array<i64: 1, 1, 32>}, {pipeline_mode = #tpu.pipeline_mode<synchronous>, transform_indices = @transform_7, window_bounds = array<i64: 1, 32, 32>}, {pipeline_mode = #tpu.pipeline_mode<synchronous>, transform_indices = @transform_8, window_bounds = array<i64: 1, 1, 32>}, {pipeline_mode = #tpu.pipeline_mode<synchronous>, transform_indices = @transform_9, window_bounds = array<i64: 32, 32>}, {pipeline_mode = #tpu.pipeline_mode<synchronous>, transform_indices = @transform_10, window_bounds = array<i64: 1, 32>}, {transform_indices = @transform_11, window_bounds = array<i64: 1, 8, 32>}, {transform_indices = @transform_12, window_bounds = array<i64: 1, 4, 8, 8>}]} {
    %c0 = arith.constant 0 : index
    %c0_0 = arith.constant 0 : index
    %c0_1 = arith.constant 0 : index
    %0 = vector.load %arg3[%c0, %c0_0, %c0_1] : memref<1x8x32xbf16, #tpu.memory_space<vmem>>, vector<1x8x32xbf16>
    %1 = vector.shape_cast %0 : vector<1x8x32xbf16> to vector<8x32xbf16>
    %c0_2 = arith.constant 0 : index
    %c0_3 = arith.constant 0 : index
    %c0_4 = arith.constant 0 : index
    %2 = vector.load %arg4[%c0_2, %c0_3, %c0_4] : memref<1x8x32xbf16, #tpu.memory_space<vmem>>, vector<1x8x32xbf16>
    %3 = vector.shape_cast %2 : vector<1x8x32xbf16> to vector<8x32xbf16>
    %c0_5 = arith.constant 0 : index
    %c0_6 = arith.constant 0 : index
    %c0_7 = arith.constant 0 : index
    %4 = vector.load %arg5[%c0_5, %c0_6, %c0_7] : memref<1x8x32xbf16, #tpu.memory_space<vmem>>, vector<1x8x32xbf16>
    %5 = vector.shape_cast %4 : vector<1x8x32xbf16> to vector<8x32xbf16>
    %6 = arith.index_cast %arg2 : i32 to index
    %c0_8 = arith.constant 0 : index
    %c0_9 = arith.constant 0 : index
    %7 = vector.load %arg6[%6, %c0_8, %c0_9] : memref<1x32x32xbf16, #tpu.memory_space<vmem>>, vector<1x32x32xbf16>
    %8 = vector.shape_cast %7 : vector<1x32x32xbf16> to vector<32x32xbf16>
    %cst = arith.constant dense<0.000000e+00> : vector<8x32xf32>
    %9 = tpu.matmul %1, %8, %cst {dimension_numbers = #tpu.dot_dimension_numbers<[1], [0], [0], [1], [0, 0, 1, 1], [], []>} : vector<8x32xbf16>, vector<32x32xbf16>, vector<8x32xf32> -> vector<8x32xf32>
    %10 = arith.index_cast %arg2 : i32 to index
    %c0_10 = arith.constant 0 : index
    %c0_11 = arith.constant 0 : index
    %11 = vector.load %arg7[%10, %c0_10, %c0_11] : memref<1x1x32xf32, #tpu.memory_space<vmem>>, vector<1x1x32xf32>
    %12 = vector.shape_cast %11 : vector<1x1x32xf32> to vector<1x32xf32>
    %13 = vector.broadcast %12 : vector<1x32xf32> to vector<8x32xf32>
    %14 = arith.addf %9, %13 : vector<8x32xf32>
    %15 = arith.index_cast %arg2 : i32 to index
    %c0_12 = arith.constant 0 : index
    %c0_13 = arith.constant 0 : index
    %16 = vector.load %arg8[%15, %c0_12, %c0_13] : memref<1x32x32xbf16, #tpu.memory_space<vmem>>, vector<1x32x32xbf16>
    %17 = vector.shape_cast %16 : vector<1x32x32xbf16> to vector<32x32xbf16>
    %cst_14 = arith.constant dense<0.000000e+00> : vector<8x32xf32>
    %18 = tpu.matmul %3, %17, %cst_14 {dimension_numbers = #tpu.dot_dimension_numbers<[1], [0], [0], [1], [0, 0, 1, 1], [], []>} : vector<8x32xbf16>, vector<32x32xbf16>, vector<8x32xf32> -> vector<8x32xf32>
    %19 = arith.index_cast %arg2 : i32 to index
    %c0_15 = arith.constant 0 : index
    %c0_16 = arith.constant 0 : index
    %20 = vector.load %arg9[%19, %c0_15, %c0_16] : memref<1x1x32xf32, #tpu.memory_space<vmem>>, vector<1x1x32xf32>
    %21 = vector.shape_cast %20 : vector<1x1x32xf32> to vector<1x32xf32>
    %22 = vector.broadcast %21 : vector<1x32xf32> to vector<8x32xf32>
    %23 = arith.addf %18, %22 : vector<8x32xf32>
    %24 = arith.index_cast %arg2 : i32 to index
    %c0_17 = arith.constant 0 : index
    %c0_18 = arith.constant 0 : index
    %25 = vector.load %arg10[%24, %c0_17, %c0_18] : memref<1x32x32xbf16, #tpu.memory_space<vmem>>, vector<1x32x32xbf16>
    %26 = vector.shape_cast %25 : vector<1x32x32xbf16> to vector<32x32xbf16>
    %cst_19 = arith.constant dense<0.000000e+00> : vector<8x32xf32>
    %27 = tpu.matmul %5, %26, %cst_19 {dimension_numbers = #tpu.dot_dimension_numbers<[1], [0], [0], [1], [0, 0, 1, 1], [], []>} : vector<8x32xbf16>, vector<32x32xbf16>, vector<8x32xf32> -> vector<8x32xf32>
    %28 = arith.index_cast %arg2 : i32 to index
    %c0_20 = arith.constant 0 : index
    %c0_21 = arith.constant 0 : index
    %29 = vector.load %arg11[%28, %c0_20, %c0_21] : memref<1x1x32xf32, #tpu.memory_space<vmem>>, vector<1x1x32xf32>
    %30 = vector.shape_cast %29 : vector<1x1x32xf32> to vector<1x32xf32>
    %31 = vector.broadcast %30 : vector<1x32xf32> to vector<8x32xf32>
    %32 = arith.addf %27, %31 : vector<8x32xf32>
    %33 = vector.extract_strided_slice %14 {offsets = [0, 0], sizes = [8, 8], strides = [1, 1]} : vector<8x32xf32> to vector<8x8xf32>
    %34 = arith.truncf %33 : vector<8x8xf32> to vector<8x8xbf16>
    %35 = vector.extract_strided_slice %23 {offsets = [0, 0], sizes = [8, 8], strides = [1, 1]} : vector<8x32xf32> to vector<8x8xf32>
    %36 = arith.truncf %35 : vector<8x8xf32> to vector<8x8xbf16>
    %cst_22 = arith.constant dense<0.000000e+00> : vector<8x8xf32>
    %37 = tpu.matmul %34, %36, %cst_22 {dimension_numbers = #tpu.dot_dimension_numbers<[1], [1], [0], [0], [0, 0, 1, 0], [], []>} : vector<8x8xbf16>, vector<8x8xbf16>, vector<8x8xf32> -> vector<8x8xf32>
    %cst_23 = arith.constant dense<0xFF800000> : vector<8xf32>
    %38 = vector.multi_reduction <maximumf>, %37, %cst_23 [1] : vector<8x8xf32> to vector<8xf32>
    %39 = vector.shape_cast %38 : vector<8xf32> to vector<8x1xf32>
    %40 = vector.broadcast %39 : vector<8x1xf32> to vector<8x8xf32>
    %41 = arith.subf %37, %40 : vector<8x8xf32>
    %42 = math.exp %41 : vector<8x8xf32>
    %cst_24 = arith.constant dense<0.000000e+00> : vector<8xf32>
    %43 = vector.multi_reduction <add>, %42, %cst_24 [1] : vector<8x8xf32> to vector<8xf32>
    %44 = vector.shape_cast %43 : vector<8xf32> to vector<8x1xf32>
    %45 = tpu.reciprocal %44 {approx = true} : vector<8x1xf32> -> vector<8x1xf32>
    %46 = vector.broadcast %45 : vector<8x1xf32> to vector<8x8xf32>
    %47 = arith.mulf %42, %46 : vector<8x8xf32>
    %48 = arith.truncf %47 : vector<8x8xf32> to vector<8x8xbf16>
    %c0_25 = arith.constant 0 : index
    %c0_26 = arith.constant 0 : index
    %c0_27 = arith.constant 0 : index
    %c0_28 = arith.constant 0 : index
    %49 = vector.load %arg15[%c0_25, %c0_26, %c0_27, %c0_28] : memref<1x4x8x8xbf16, #tpu.memory_space<vmem>>, vector<1x1x8x8xbf16>
    %50 = vector.shape_cast %49 : vector<1x1x8x8xbf16> to vector<8x8xbf16>
    %51 = vector.shape_cast %48 : vector<8x8xbf16> to vector<1x1x8x8xbf16>
    tpu.vector_store %arg15[%c0_25, %c0_26, %c0_27, %c0_28], %51 {strides = array<i32>} : memref<1x4x8x8xbf16, #tpu.memory_space<vmem>>, vector<1x1x8x8xbf16>,
    %52 = arith.truncf %47 : vector<8x8xf32> to vector<8x8xbf16>
    %53 = vector.extract_strided_slice %32 {offsets = [0, 0], sizes = [8, 8], strides = [1, 1]} : vector<8x32xf32> to vector<8x8xf32>
    %54 = arith.truncf %53 : vector<8x8xf32> to vector<8x8xbf16>
    %cst_29 = arith.constant dense<0.000000e+00> : vector<8x8xf32>
    %55 = tpu.matmul %52, %54, %cst_29 {dimension_numbers = #tpu.dot_dimension_numbers<[1], [0], [0], [1], [0, 0, 1, 1], [], []>} : vector<8x8xbf16>, vector<8x8xbf16>, vector<8x8xf32> -> vector<8x8xf32>
    %56 = vector.extract_strided_slice %14 {offsets = [0, 8], sizes = [8, 8], strides = [1, 1]} : vector<8x32xf32> to vector<8x8xf32>
    %57 = arith.truncf %56 : vector<8x8xf32> to vector<8x8xbf16>
    %58 = vector.extract_strided_slice %23 {offsets = [0, 8], sizes = [8, 8], strides = [1, 1]} : vector<8x32xf32> to vector<8x8xf32>
    %59 = arith.truncf %58 : vector<8x8xf32> to vector<8x8xbf16>
    %cst_30 = arith.constant dense<0.000000e+00> : vector<8x8xf32>
    %60 = tpu.matmul %57, %59, %cst_30 {dimension_numbers = #tpu.dot_dimension_numbers<[1], [1], [0], [0], [0, 0, 1, 0], [], []>} : vector<8x8xbf16>, vector<8x8xbf16>, vector<8x8xf32> -> vector<8x8xf32>
    %cst_31 = arith.constant dense<0xFF800000> : vector<8xf32>
    %61 = vector.multi_reduction <maximumf>, %60, %cst_31 [1] : vector<8x8xf32> to vector<8xf32>
    %62 = vector.shape_cast %61 : vector<8xf32> to vector<8x1xf32>
    %63 = vector.broadcast %62 : vector<8x1xf32> to vector<8x8xf32>
    %64 = arith.subf %60, %63 : vector<8x8xf32>
    %65 = math.exp %64 : vector<8x8xf32>
    %cst_32 = arith.constant dense<0.000000e+00> : vector<8xf32>
    %66 = vector.multi_reduction <add>, %65, %cst_32 [1] : vector<8x8xf32> to vector<8xf32>
    %67 = vector.shape_cast %66 : vector<8xf32> to vector<8x1xf32>
    %68 = tpu.reciprocal %67 {approx = true} : vector<8x1xf32> -> vector<8x1xf32>
    %69 = vector.broadcast %68 : vector<8x1xf32> to vector<8x8xf32>
    %70 = arith.mulf %65, %69 : vector<8x8xf32>
    %71 = arith.truncf %70 : vector<8x8xf32> to vector<8x8xbf16>
    %c0_33 = arith.constant 0 : index
    %c1 = arith.constant 1 : index
    %c0_34 = arith.constant 0 : index
    %c0_35 = arith.constant 0 : index
    %72 = vector.load %arg15[%c0_33, %c1, %c0_34, %c0_35] : memref<1x4x8x8xbf16, #tpu.memory_space<vmem>>, vector<1x1x8x8xbf16>
    %73 = vector.shape_cast %72 : vector<1x1x8x8xbf16> to vector<8x8xbf16>
    %74 = vector.shape_cast %71 : vector<8x8xbf16> to vector<1x1x8x8xbf16>
    tpu.vector_store %arg15[%c0_33, %c1, %c0_34, %c0_35], %74 {strides = array<i32>} : memref<1x4x8x8xbf16, #tpu.memory_space<vmem>>, vector<1x1x8x8xbf16>,
    %75 = arith.truncf %70 : vector<8x8xf32> to vector<8x8xbf16>
    %76 = vector.extract_strided_slice %32 {offsets = [0, 8], sizes = [8, 8], strides = [1, 1]} : vector<8x32xf32> to vector<8x8xf32>
    %77 = arith.truncf %76 : vector<8x8xf32> to vector<8x8xbf16>
    %cst_36 = arith.constant dense<0.000000e+00> : vector<8x8xf32>
    %78 = tpu.matmul %75, %77, %cst_36 {dimension_numbers = #tpu.dot_dimension_numbers<[1], [0], [0], [1], [0, 0, 1, 1], [], []>} : vector<8x8xbf16>, vector<8x8xbf16>, vector<8x8xf32> -> vector<8x8xf32>
    %79 = vector.extract_strided_slice %14 {offsets = [0, 16], sizes = [8, 8], strides = [1, 1]} : vector<8x32xf32> to vector<8x8xf32>
    %80 = arith.truncf %79 : vector<8x8xf32> to vector<8x8xbf16>
    %81 = vector.extract_strided_slice %23 {offsets = [0, 16], sizes = [8, 8], strides = [1, 1]} : vector<8x32xf32> to vector<8x8xf32>
    %82 = arith.truncf %81 : vector<8x8xf32> to vector<8x8xbf16>
    %cst_37 = arith.constant dense<0.000000e+00> : vector<8x8xf32>
    %83 = tpu.matmul %80, %82, %cst_37 {dimension_numbers = #tpu.dot_dimension_numbers<[1], [1], [0], [0], [0, 0, 1, 0], [], []>} : vector<8x8xbf16>, vector<8x8xbf16>, vector<8x8xf32> -> vector<8x8xf32>
    %cst_38 = arith.constant dense<0xFF800000> : vector<8xf32>
    %84 = vector.multi_reduction <maximumf>, %83, %cst_38 [1] : vector<8x8xf32> to vector<8xf32>
    %85 = vector.shape_cast %84 : vector<8xf32> to vector<8x1xf32>
    %86 = vector.broadcast %85 : vector<8x1xf32> to vector<8x8xf32>
    %87 = arith.subf %83, %86 : vector<8x8xf32>
    %88 = math.exp %87 : vector<8x8xf32>
    %cst_39 = arith.constant dense<0.000000e+00> : vector<8xf32>
    %89 = vector.multi_reduction <add>, %88, %cst_39 [1] : vector<8x8xf32> to vector<8xf32>
    %90 = vector.shape_cast %89 : vector<8xf32> to vector<8x1xf32>
    %91 = tpu.reciprocal %90 {approx = true} : vector<8x1xf32> -> vector<8x1xf32>
    %92 = vector.broadcast %91 : vector<8x1xf32> to vector<8x8xf32>
    %93 = arith.mulf %88, %92 : vector<8x8xf32>
    %94 = arith.truncf %93 : vector<8x8xf32> to vector<8x8xbf16>
    %c0_40 = arith.constant 0 : index
    %c2 = arith.constant 2 : index
    %c0_41 = arith.constant 0 : index
    %c0_42 = arith.constant 0 : index
    %95 = vector.load %arg15[%c0_40, %c2, %c0_41, %c0_42] : memref<1x4x8x8xbf16, #tpu.memory_space<vmem>>, vector<1x1x8x8xbf16>
    %96 = vector.shape_cast %95 : vector<1x1x8x8xbf16> to vector<8x8xbf16>
    %97 = vector.shape_cast %94 : vector<8x8xbf16> to vector<1x1x8x8xbf16>
    tpu.vector_store %arg15[%c0_40, %c2, %c0_41, %c0_42], %97 {strides = array<i32>} : memref<1x4x8x8xbf16, #tpu.memory_space<vmem>>, vector<1x1x8x8xbf16>,
    %98 = arith.truncf %93 : vector<8x8xf32> to vector<8x8xbf16>
    %99 = vector.extract_strided_slice %32 {offsets = [0, 16], sizes = [8, 8], strides = [1, 1]} : vector<8x32xf32> to vector<8x8xf32>
    %100 = arith.truncf %99 : vector<8x8xf32> to vector<8x8xbf16>
    %cst_43 = arith.constant dense<0.000000e+00> : vector<8x8xf32>
    %101 = tpu.matmul %98, %100, %cst_43 {dimension_numbers = #tpu.dot_dimension_numbers<[1], [0], [0], [1], [0, 0, 1, 1], [], []>} : vector<8x8xbf16>, vector<8x8xbf16>, vector<8x8xf32> -> vector<8x8xf32>
    %102 = vector.extract_strided_slice %14 {offsets = [0, 24], sizes = [8, 8], strides = [1, 1]} : vector<8x32xf32> to vector<8x8xf32>
    %103 = arith.truncf %102 : vector<8x8xf32> to vector<8x8xbf16>
    %104 = vector.extract_strided_slice %23 {offsets = [0, 24], sizes = [8, 8], strides = [1, 1]} : vector<8x32xf32> to vector<8x8xf32>
    %105 = arith.truncf %104 : vector<8x8xf32> to vector<8x8xbf16>
    %cst_44 = arith.constant dense<0.000000e+00> : vector<8x8xf32>
    %106 = tpu.matmul %103, %105, %cst_44 {dimension_numbers = #tpu.dot_dimension_numbers<[1], [1], [0], [0], [0, 0, 1, 0], [], []>} : vector<8x8xbf16>, vector<8x8xbf16>, vector<8x8xf32> -> vector<8x8xf32>
    %cst_45 = arith.constant dense<0xFF800000> : vector<8xf32>
    %107 = vector.multi_reduction <maximumf>, %106, %cst_45 [1] : vector<8x8xf32> to vector<8xf32>
    %108 = vector.shape_cast %107 : vector<8xf32> to vector<8x1xf32>
    %109 = vector.broadcast %108 : vector<8x1xf32> to vector<8x8xf32>
    %110 = arith.subf %106, %109 : vector<8x8xf32>
    %111 = math.exp %110 : vector<8x8xf32>
    %cst_46 = arith.constant dense<0.000000e+00> : vector<8xf32>
    %112 = vector.multi_reduction <add>, %111, %cst_46 [1] : vector<8x8xf32> to vector<8xf32>
    %113 = vector.shape_cast %112 : vector<8xf32> to vector<8x1xf32>
    %114 = tpu.reciprocal %113 {approx = true} : vector<8x1xf32> -> vector<8x1xf32>
    %115 = vector.broadcast %114 : vector<8x1xf32> to vector<8x8xf32>
    %116 = arith.mulf %111, %115 : vector<8x8xf32>
    %117 = arith.truncf %116 : vector<8x8xf32> to vector<8x8xbf16>
    %c0_47 = arith.constant 0 : index
    %c3 = arith.constant 3 : index
    %c0_48 = arith.constant 0 : index
    %c0_49 = arith.constant 0 : index
    %118 = vector.load %arg15[%c0_47, %c3, %c0_48, %c0_49] : memref<1x4x8x8xbf16, #tpu.memory_space<vmem>>, vector<1x1x8x8xbf16>
    %119 = vector.shape_cast %118 : vector<1x1x8x8xbf16> to vector<8x8xbf16>
    %120 = vector.shape_cast %117 : vector<8x8xbf16> to vector<1x1x8x8xbf16>
    tpu.vector_store %arg15[%c0_47, %c3, %c0_48, %c0_49], %120 {strides = array<i32>} : memref<1x4x8x8xbf16, #tpu.memory_space<vmem>>, vector<1x1x8x8xbf16>,
    %121 = arith.truncf %116 : vector<8x8xf32> to vector<8x8xbf16>
    %122 = vector.extract_strided_slice %32 {offsets = [0, 24], sizes = [8, 8], strides = [1, 1]} : vector<8x32xf32> to vector<8x8xf32>
    %123 = arith.truncf %122 : vector<8x8xf32> to vector<8x8xbf16>
    %cst_50 = arith.constant dense<0.000000e+00> : vector<8x8xf32>
    %124 = tpu.matmul %121, %123, %cst_50 {dimension_numbers = #tpu.dot_dimension_numbers<[1], [0], [0], [1], [0, 0, 1, 1], [], []>} : vector<8x8xbf16>, vector<8x8xbf16>, vector<8x8xf32> -> vector<8x8xf32>
    %125 = tpu.concatenate %55, %78, %101, %124 in 1 : vector<8x8xf32>, vector<8x8xf32>, vector<8x8xf32>, vector<8x8xf32> -> vector<8x32xf32>
    %c0_51 = arith.constant 0 : index
    %c0_52 = arith.constant 0 : index
    %126 = vector.load %arg12[%c0_51, %c0_52] : memref<32x32xbf16, #tpu.memory_space<vmem>>, vector<32x32xbf16>
    %127 = arith.truncf %125 : vector<8x32xf32> to vector<8x32xbf16>
    %cst_53 = arith.constant dense<0.000000e+00> : vector<8x32xf32>
    %128 = tpu.matmul %127, %126, %cst_53 {dimension_numbers = #tpu.dot_dimension_numbers<[1], [0], [0], [1], [0, 0, 1, 1], [], []>} : vector<8x32xbf16>, vector<32x32xbf16>, vector<8x32xf32> -> vector<8x32xf32>
    %c0_i32 = arith.constant 0 : i32
    %129 = arith.cmpi eq, %arg2, %c0_i32 : i32
    %130 = arith.extui %129 : i1 to i32
    %c0_i32_54 = arith.constant 0 : i32
    %131 = arith.cmpi ne, %130, %c0_i32_54 : i32
    scf.if %131 {
      %cst_61 = arith.constant 0.000000e+00 : f32
      %138 = vector.broadcast %cst_61 : f32 to vector<8x32xf32>
      %c0_62 = arith.constant 0 : index
      %c0_63 = arith.constant 0 : index
      %139 = vector.load %arg16[%c0_62, %c0_63] : memref<8x32xf32, #tpu.memory_space<vmem>>, vector<8x32xf32>
      tpu.vector_store %arg16[%c0_62, %c0_63], %138 {strides = array<i32>} : memref<8x32xf32, #tpu.memory_space<vmem>>, vector<8x32xf32>,
    } else {
    }
    %c0_55 = arith.constant 0 : index
    %c0_56 = arith.constant 0 : index
    %132 = vector.load %arg16[%c0_55, %c0_56] : memref<8x32xf32, #tpu.memory_space<vmem>>, vector<8x32xf32>
    %133 = arith.addf %132, %128 : vector<8x32xf32>
    %c0_57 = arith.constant 0 : index
    %c0_58 = arith.constant 0 : index
    %134 = vector.load %arg16[%c0_57, %c0_58] : memref<8x32xf32, #tpu.memory_space<vmem>>, vector<8x32xf32>
    tpu.vector_store %arg16[%c0_57, %c0_58], %133 {strides = array<i32>} : memref<8x32xf32, #tpu.memory_space<vmem>>, vector<8x32xf32>,
    %c0_i32_59 = arith.constant 0 : i32
    %135 = arith.cmpi eq, %arg2, %c0_i32_59 : i32
    %136 = arith.extui %135 : i1 to i32
    %c0_i32_60 = arith.constant 0 : i32
    %137 = arith.cmpi ne, %136, %c0_i32_60 : i32
    scf.if %137 {
      %c0_61 = arith.constant 0 : index
      %c0_62 = arith.constant 0 : index
      %138 = vector.load %arg16[%c0_61, %c0_62] : memref<8x32xf32, #tpu.memory_space<vmem>>, vector<8x32xf32>
      %c0_63 = arith.constant 0 : index
      %c0_64 = arith.constant 0 : index
      %139 = vector.load %arg13[%c0_63, %c0_64] : memref<1x32xf32, #tpu.memory_space<vmem>>, vector<1x32xf32>
      %140 = vector.broadcast %139 : vector<1x32xf32> to vector<8x32xf32>
      %141 = arith.addf %138, %140 : vector<8x32xf32>
      %c0_65 = arith.constant 0 : index
      %c0_66 = arith.constant 0 : index
      %c0_67 = arith.constant 0 : index
      %142 = vector.load %arg14[%c0_65, %c0_66, %c0_67] : memref<1x8x32xf32, #tpu.memory_space<vmem>>, vector<1x8x32xf32>
      %143 = vector.shape_cast %142 : vector<1x8x32xf32> to vector<8x32xf32>
      %144 = vector.shape_cast %141 : vector<8x32xf32> to vector<1x8x32xf32>
      tpu.vector_store %arg14[%c0_65, %c0_66, %c0_67], %144 {strides = array<i32>} : memref<1x8x32xf32, #tpu.memory_space<vmem>>, vector<1x8x32xf32>,
    } else {
    }
    return
  }
  func.func @transform_0(%arg0: i32, %arg1: i32, %arg2: i32) -> (i32, i32, i32) {
    %c0_i32 = arith.constant 0 : i32
    %c0_i32_0 = arith.constant 0 : i32
    return %arg0, %arg1, %c0_i32 : i32, i32, i32
  }
  func.func @transform_1(%arg0: i32, %arg1: i32, %arg2: i32) -> (i32, i32, i32) {
    %c0_i32 = arith.constant 0 : i32
    %c0_i32_0 = arith.constant 0 : i32
    %c0_i32_1 = arith.constant 0 : i32
    return %arg0, %c0_i32, %c0_i32_0 : i32, i32, i32
  }
  func.func @transform_2(%arg0: i32, %arg1: i32, %arg2: i32) -> (i32, i32, i32) {
    %c0_i32 = arith.constant 0 : i32
    %c0_i32_0 = arith.constant 0 : i32
    %c0_i32_1 = arith.constant 0 : i32
    return %arg0, %c0_i32, %c0_i32_0 : i32, i32, i32
  }
  func.func @transform_3(%arg0: i32, %arg1: i32, %arg2: i32) -> (i32, i32, i32) {
    %c0_i32 = arith.constant 0 : i32
    %c0_i32_0 = arith.constant 0 : i32
    %c0_i32_1 = arith.constant 0 : i32
    %c0_i32_2 = arith.constant 0 : i32
    return %c0_i32, %c0_i32_0, %c0_i32_1 : i32, i32, i32
  }
  func.func @transform_4(%arg0: i32, %arg1: i32, %arg2: i32) -> (i32, i32, i32) {
    %c0_i32 = arith.constant 0 : i32
    %c0_i32_0 = arith.constant 0 : i32
    %c0_i32_1 = arith.constant 0 : i32
    %c0_i32_2 = arith.constant 0 : i32
    return %c0_i32, %c0_i32_0, %c0_i32_1 : i32, i32, i32
  }
  func.func @transform_5(%arg0: i32, %arg1: i32, %arg2: i32) -> (i32, i32, i32) {
    %c0_i32 = arith.constant 0 : i32
    %c0_i32_0 = arith.constant 0 : i32
    %c0_i32_1 = arith.constant 0 : i32
    %c0_i32_2 = arith.constant 0 : i32
    return %c0_i32, %c0_i32_0, %c0_i32_1 : i32, i32, i32
  }
  func.func @transform_6(%arg0: i32, %arg1: i32, %arg2: i32) -> (i32, i32, i32) {
    %c0_i32 = arith.constant 0 : i32
    %c0_i32_0 = arith.constant 0 : i32
    %c0_i32_1 = arith.constant 0 : i32
    %c0_i32_2 = arith.constant 0 : i32
    return %c0_i32, %c0_i32_0, %c0_i32_1 : i32, i32, i32
  }
  func.func @transform_7(%arg0: i32, %arg1: i32, %arg2: i32) -> (i32, i32, i32) {
    %c0_i32 = arith.constant 0 : i32
    %c0_i32_0 = arith.constant 0 : i32
    %c0_i32_1 = arith.constant 0 : i32
    %c0_i32_2 = arith.constant 0 : i32
    return %c0_i32, %c0_i32_0, %c0_i32_1 : i32, i32, i32
  }
  func.func @transform_8(%arg0: i32, %arg1: i32, %arg2: i32) -> (i32, i32, i32) {
    %c0_i32 = arith.constant 0 : i32
    %c0_i32_0 = arith.constant 0 : i32
    %c0_i32_1 = arith.constant 0 : i32
    %c0_i32_2 = arith.constant 0 : i32
    return %c0_i32, %c0_i32_0, %c0_i32_1 : i32, i32, i32
  }
  func.func @transform_9(%arg0: i32, %arg1: i32, %arg2: i32) -> (i32, i32) {
    %c0_i32 = arith.constant 0 : i32
    %c0_i32_0 = arith.constant 0 : i32
    %c0_i32_1 = arith.constant 0 : i32
    return %c0_i32, %c0_i32_0 : i32, i32
  }
  func.func @transform_10(%arg0: i32, %arg1: i32, %arg2: i32) -> (i32, i32) {
    %c0_i32 = arith.constant 0 : i32
    %c0_i32_0 = arith.constant 0 : i32
    %c0_i32_1 = arith.constant 0 : i32
    return %c0_i32, %c0_i32_0 : i32, i32
  }
  func.func @transform_11(%arg0: i32, %arg1: i32, %arg2: i32) -> (i32, i32, i32) {
    %c0_i32 = arith.constant 0 : i32
    %c0_i32_0 = arith.constant 0 : i32
    return %arg0, %arg1, %c0_i32 : i32, i32, i32
  }
  func.func @transform_12(%arg0: i32, %arg1: i32, %arg2: i32) -> (i32, i32, i32, i32) {
    %c0_i32 = arith.constant 0 : i32
    %c0_i32_0 = arith.constant 0 : i32
    return %arg0, %arg2, %arg1, %c0_i32 : i32, i32, i32, i32
  }
}

</mosaic_0001>

<bundles_post_ra>
// kernel: tpu_custom_call.1
= control target key start
LH: loop header
LB: loop body
LE: loop exit
PB: predicated region body
PF: predicated region fallthrough
CT: control target
= control target key end

     0   :  { %s2766_s0 = inlined_call_operand.hbm [shape: bf16[2,8,32], index: 0, kind: input, shape index: {}]   ;;  %s2767_s1 = inlined_call_operand.hbm [shape: bf16[2,8,32], index: 1, kind: input, shape index: {}]   ;;  %s2768_s2 = inlined_call_operand.hbm [shape: bf16[2,8,32], index: 2, kind: input, shape index: {}]   ;;  %s2769_s3 = inlined_call_operand.hbm [shape: bf16[1,32,32], index: 3, kind: input, shape index: {}]   ;;  %s2770_s4 = inlined_call_operand.vmem [shape: f32[1,1,32], index: 4, kind: input, shape index: {}]   ;;  %s2771_s5 = inlined_call_operand.vmem [shape: bf16[1,32,32], index: 5, kind: input, shape index: {}]   ;;  %s2772_s6 = inlined_call_operand.vmem [shape: f32[1,1,32], index: 6, kind: input, shape index: {}]   ;;  %s2773_s7 = inlined_call_operand.hbm [shape: bf16[1,32,32], index: 7, kind: input, shape index: {}]   ;;  %s2774_s8 = inlined_call_operand.hbm [shape: f32[1,1,32], index: 8, kind: input, shape index: {}]   ;;  %s2775_s9 = inlined_call_operand.vmem [shape: bf16[32,32], index: 9, kind: input, shape index: {}]   ;;  %s2776_s10 = inlined_call_operand.vmem [shape: f32[1,32], index: 10, kind: input, shape index: {}]   ;;  %s2777_s11 = inlined_call_operand.hbm [shape: f32[2,8,32], index: 11, kind: output, shape index: {0}]   ;;  %s2778_s12 = inlined_call_operand.hbm [shape: bf16[2,4,8,8], index: 12, kind: output, shape index: {1}]  }
   0x1   :  { %2806 = sst [smem:[#allocation31_spill]] %s2767_s1 }
   0x2   :  { %2807 = sst [smem:[#allocation32_spill]] %s2769_s3 }
   0x3   :  { %2808 = sst [smem:[#allocation33_spill]] %s2770_s4 }
   0x4   :  { %2809 = sst [smem:[#allocation34_spill]] %s2772_s6 }
   0x5   :  { %2810 = sst [smem:[#allocation35_spill]] %s2775_s9 }
   0x6   :  { %2811 = sst [smem:[#allocation36_spill]] %s2776_s10 }
   0x7   :  { %2812 = sst [smem:[#allocation37_spill]] %s2777_s11 }
   0x8   :  { %2813 = sst [smem:[#allocation38_spill]] %s2778_s12 }
   0x9   :  { %18 = vsyncpa [#allocation4], 0 }
   0xa   :  { %20 = vsyncpa [#allocation4 + $0x1], 0 }
   0xb   :  { %21 = vsyncpa [#allocation7], 0 }
   0xc   :  { %23 = vsyncpa [#allocation7 + $0x1], 0 }
   0xd   :  { %24 = vsyncpa [#allocation10], 0 }
   0xe   :  { %25 = vsyncpa [#allocation13], 0 }
   0xf   :  { %26 = vsyncpa [#allocation5], 0 }
  0x10   :  { %28 = vsyncpa [#allocation5 + $0x1], 0 }
  0x11   :  { %29 = vsyncpa [#allocation16], 0 }
  0x12   :  { %31 = vsyncpa [#allocation16 + $0x1], 0  ;;  %s2278_s21 = smov 0   ;;  %s2280_s22 = smov 0  }
  0x13   :  { %s2282_s23 = smov 0   ;;  %s2284_s24 = smov 0  }
  0x14   :  { %s2286_s25 = smov 0   ;;  %s2288_s26 = smov 0  }
  0x15 LB: > { %2814 = sst [smem:[#allocation23_spill]] %s2171_s21  ;;  %s2309_s27 = sadd.s32 4294967295, %s2191_s26   ;;  %s2191_s26 = sphi %s2288_s26, %s37_s26   ;;  %s2187_s25 = sphi %s2286_s25, %s2864_s25   ;;  %s2183_s24 = sphi %s2284_s24, %s2863_s24   ;;  %s2179_s23 = sphi %s2282_s23, %s2867_s23   ;;  %s2175_s22 = sphi %s2280_s22, %s2866_s22   ;;  %s2171_s21 = sphi %s2278_s21, %s2865_s21  }
  0x16   : > { %2815 = sst [smem:[#allocation24_spill]] %s2183_s24  ;;  %s1583_s28 = sadd.s32 4294967294, %s2191_s26  }
  0x17   : > { %2816 = sst [smem:[#allocation25_spill]] %s2187_s25  ;;  %p78_p0 = scmp.ne.s32.totalorder %s2175_s22, %s2171_s21 }
  0x18   : > { %2817 = sst [smem:[#allocation26_spill]] %s2191_s26  ;;  %p2782_p1 = scmp.eq.s32.totalorder %s2309_s27, 0 }
  0x19   : > { %p330_p3 = scmp.eq.s32.totalorder %s1583_s28, 1  ;;  %p1584_p5 = scmp.ge.s32.totalorder %s2191_s26, 1 }
  0x1a   : > { %p2318_p4 = por %p2782_p1, %p78_p0  ;;  %p367_p7 = scmp.lt.s32.totalorder %s2191_s26, 3 }
  0x1b   : > { %p2323_p6 = por %p330_p3, %p78_p0  ;;  %s2193_s14 = smov [#allocation9]  }
  0x1c   : > { %s2818_s29 = scalar_select %p2318_p4, 1, 0 }
  0x1d   : > { %s2819_s30 = scalar_select %p2323_p6, 1, 0 }
  0x1e   : > { %p2328_p8 = pnand %p1584_p5, %p367_p7  ;;  %s379_s15 = sshll.u32 %s2193_s14, 4  ;;  %s380_s15 = int_to_ptr.vmem [resolvable:$true] %s379_s15 }
  0x1f   : > { %2820 = sst [smem:[#allocation27_spill]] %s2819_s30  ;;  %s56_s17 = sadd.s32 1, %s2187_s25 }
  0x20   : > { %s2821_s13 = scalar_select %p2328_p8, 1, 0 }
  0x21   : > { %p1769_p9 = pneg %p2328_p8  ;;  %s2823_s3 = sld [smem:[#allocation32_spill]] }
  0x23   : > { %p2337_p11 = pnand %p1769_p9, %p2782_p1 }
  0x25   : > { %s2822_s16 = scalar_select %p2337_p11, 1, 0 }
  0x26   : > { %p2350_p13 = pneg %p2337_p11 }
  0x27   : > { %s1891_s20 = scalar_lea.hbm %s2823_s3, 256 }
  0x28   : > { %p1892_p12 = scmp.ne.s32.totalorder %s2823_s3, %s1891_s20  ;;  %p1898_p5 = scmp.lt.u32.totalorder %s1891_s20, %s2823_s3 }
  0x29   : > { %s2824_s14 = scalar_select %p2350_p13, 1, 0 }
  0x2a   : > { %p1894_p0 = pnand %p2350_p13, %p1892_p12 }
  0x2c   : > { %p1895_p3 = pneg %p1894_p0 }
  0x2e   : > { %p1900_p7 = pnand %p1898_p5, %p1895_p3 }
  0x30   : > { %1903 = shalt.err (!%p1900_p7)
}
  0x31   : > { %s1904_s18 = scalar_lea.vmem %s380_s15, 256  ;;  %p1912_p2 = scmp.lt.s32.totalorder %s380_s15, %s380_s15 }
  0x32   : > { %p1905_p9 = scmp.ne.s32.totalorder %s380_s15, %s1904_s18  ;;  %p1913_p6 = scmp.lt.s32.totalorder %s1904_s18, %s1904_s18 }
  0x34   : > { %p1907_p10 = pnand %p1905_p9, %p2350_p13  ;;  %p1914_p4 = por %p1913_p6, %p1912_p2 }
  0x36   : > { %p1908_p1 = pneg %p1907_p10 }
  0x38   : > { %p1915_p8 = pnand %p1914_p4, %p1908_p1 }
  0x3a   : > { %1918 = shalt.err (!%p1915_p8)
}
  0x3b   : > { %s2785_s30 = smov 64   ;;  %s2786_s11 = smov 4  }
  0x3c   : > { %1772 = dma.hbm_to_vmem [thread:$0]  (!%p2337_p11), %s2823_s3, 256, %s380_s15, [#allocation10], %s2785_s30, %s2785_s30, %s2786_s11  }
  0x3d   : > { %p58_p1 = scmp.ge.s32.totalorder %s56_s17, 2  ;;  %s65_s20 = sadd.s32 1, %s2179_s23 }
  0x3e   : > { %p72_p2 = scmp.ne.s32.totalorder %s2179_s23, %s2175_s22  ;;  %p73_p4 = scmp.eq.s32.totalorder %s2191_s26, 0 }
  0x3f   : > { %s2869_s17 = smov (%p58_p1, %s56_s17), 0  ;;  %p2826_p8 = scmp.eq.s32.totalorder %s2309_s27, 1 }
  0x40   : > { %2825 = sst [smem:[#allocation28_spill]] %s2869_s17  ;;  %p74_p6 = por %p73_p4, %p72_p2 }
  0x41   : > { %p2377_p10 = por %p2826_p8, %p72_p2  ;;  %s60_s18 = ssub.s32 %s2187_s25, %s2869_s17 }
  0x42   : > { %p1799_p12 = scmp.lt.s32.totalorder %s2191_s26, 2  ;;  %p63_p0 = scmp.eq.s32.totalorder %s60_s18, 0 }
  0x43   : > { %s2827_s28 = scalar_select %p2377_p10, 1, 0 }
  0x44   : > { %s2788_s10 = sand.u32 1, %s2179_s23   ;;  %s2390_s21 = sshll.u32 %s2187_s25, 6 }
  0x45   : > { %2828 = sst [smem:[#allocation29_spill]] %s2827_s28  ;;  %s2387_s15 = sshll.u32 %s2788_s10, 2 }
  0x46   : > { %s2393_s19 = scalar_select %p63_p0, %s2179_s23, %s65_s20  }
  0x47   : > { %p2395_p3 = pnand %p1799_p12, %p74_p6  ;;  %s451_s11 = sand.u32 1, %s2191_s26  }
  0x48   : > { %2829 = sst [smem:[#allocation30_spill]] %s2393_s19  ;;  %s2831_s1 = sld [smem:[#allocation31_spill]] }
  0x49   : > { %s2830_s30 = scalar_select %p2395_p3, 1, 0 }
  0x4a   : > { %s455_s10 = scalar_lea.vmem [#allocation6], %s2387_s15  ;;  %s2196_s20 = smov [#allocation11]  }
  0x4b   : > { %s462_s25 = sshll.u32 %s455_s10, 4  ;;  %s2409_s19 = sshll.u32 %s2196_s20, 4  ;;  %s2407_s25 = int_to_ptr.vmem [resolvable:$true] %s462_s25  ;;  %s402_s19 = int_to_ptr.vmem [resolvable:$true] %s2409_s19 }
  0x4c   : > { %s2411_s12 = scalar_lea.sflag [#allocation7], %s451_s11  ;;  %p2417_p7 = pneg %p2395_p3 }
  0x4e   : > { %s2404_s18 = scalar_lea.hbm %s2831_s1, %s2390_s21  ;;  %s1924_s26 = scalar_lea.hbm %s2831_s1, 128 }
  0x4f   : > { %s1919_s28 = scalar_lea.hbm %s2404_s18, 64  ;;  %p1925_p2 = scmp.lt.u32.totalorder %s2404_s18, %s2831_s1 }
  0x50   : > { %p1920_p5 = scmp.ne.s32.totalorder %s2404_s18, %s1919_s28  ;;  %p1926_p4 = scmp.lt.u32.totalorder %s1924_s26, %s1919_s28 }
  0x51   : > { %s2832_s3 = scalar_select %p2417_p7, 1, 0 }
  0x52   : > { %p1922_p9 = pnand %p2417_p7, %p1920_p5  ;;  %p1927_p6 = por %p1926_p4, %p1925_p2 }
  0x53   : > { %p1928_p8 = scmp.lt.u32.totalorder %s1919_s28, %s2404_s18 }
  0x54   : > { %p1923_p1 = pneg %p1922_p9 }
  0x55   : > { %p1929_p12 = por %p1928_p8, %p1927_p6 }
  0x57   : > { %p1930_p0 = pnand %p1929_p12, %p1923_p1 }
  0x59   : > { %1933 = shalt.err (!%p1930_p0)
}
  0x5a   : > { %s1934_s11 = scalar_lea.vmem %s2407_s25, 64  ;;  %s2197_s17 = smov [#allocation6]  }
  0x5b   : > { %p1935_p5 = scmp.ne.s32.totalorder %s2407_s25, %s1934_s11  ;;  %s1939_s10 = sshll.u32 %s2197_s17, 4  ;;  %s1940_s10 = int_to_ptr.vmem [resolvable:$false] %s1939_s10 }
  0x5c   : > { %s1941_s24 = scalar_lea.vmem %s1940_s10, 128  ;;  %p1942_p11 = scmp.lt.s32.totalorder %s2407_s25, %s1940_s10 }
  0x5d   : > { %p1937_p9 = pnand %p1935_p5, %p2417_p7  ;;  %p1943_p13 = scmp.lt.s32.totalorder %s1941_s24, %s1934_s11 }
  0x5f   : > { %p1938_p10 = pneg %p1937_p9  ;;  %p1944_p2 = por %p1943_p13, %p1942_p11 }
  0x61   : > { %p1945_p4 = pnand %p1944_p2, %p1938_p10 }
  0x63   : > { %1948 = shalt.err (!%p1945_p4)
}
  0x64   : > { %1785 = dma.hbm_to_vmem [thread:$0]  (!%p2395_p3), %s2404_s18, 64, %s2407_s25, %s2411_s12  }
  0x65   : > { %s1949_s20 = scalar_lea.hbm %s2773_s7, 256  ;;  %p2833_p11 = scmp.ne.s32.totalorder %s2824_s14, 0 }
  0x66   : > { %p1950_p1 = scmp.ne.s32.totalorder %s2773_s7, %s1949_s20  ;;  %p1956_p6 = scmp.lt.u32.totalorder %s1949_s20, %s2773_s7 }
  0x68   : > { %p1952_p13 = pnand %p1950_p1, %p2833_p11 }
  0x6a   : > { %p1953_p10 = pneg %p1952_p13 }
  0x6c   : > { %p1958_p8 = pnand %p1956_p6, %p1953_p10 }
  0x6e   : > { %1961 = shalt.err (!%p1958_p8)
}
  0x6f   : > { %s1962_s24 = scalar_lea.vmem %s402_s19, 256  ;;  %p1970_p9 = scmp.lt.s32.totalorder %s402_s19, %s402_s19 }
  0x70   : > { %p1963_p12 = scmp.ne.s32.totalorder %s402_s19, %s1962_s24  ;;  %p1971_p2 = scmp.lt.s32.totalorder %s1962_s24, %s1962_s24 }
  0x72   : > { %p1965_p0 = pnand %p1963_p12, %p2833_p11  ;;  %p1972_p4 = por %p1971_p2, %p1970_p9 }
  0x74   : > { %p1966_p5 = pneg %p1965_p0 }
  0x76   : > { %p1973_p3 = pnand %p1972_p4, %p1966_p5 }
  0x78   : > { %1976 = shalt.err (!%p1973_p3)
}
  0x79   : > { %p2834_p1 = scmp.ne.s32.totalorder %s2822_s16, 0  ;;  %s2835_s1 = smov 4  }
  0x7a   : > { %s2836_s25 = smov 64   ;;  %s2198_s28 = smov [#allocation12]  }
  0x7b   : > { %1775 = dma.hbm_to_vmem [thread:$0]  (!%p2834_p1), %s2773_s7, 256, %s402_s19, [#allocation10], %s2836_s25, %s2836_s25, %s2835_s1  }
  0x7c   : > { %s415_s20 = sshll.u32 %s2198_s28, 4  ;;  %s1977_s10 = scalar_lea.hbm %s2774_s8, 16  ;;  %s416_s20 = int_to_ptr.vmem [resolvable:$true] %s415_s20 }
  0x7d   : > { %p1978_p3 = scmp.ne.s32.totalorder %s2774_s8, %s1977_s10  ;;  %p1984_p6 = scmp.lt.u32.totalorder %s1977_s10, %s2774_s8 }
  0x7f   : > { %p1980_p13 = pnand %p1978_p3, %p2833_p11 }
  0x81   : > { %p1981_p10 = pneg %p1980_p13 }
  0x83   : > { %p1986_p8 = pnand %p1984_p6, %p1981_p10 }
  0x85   : > { %1989 = shalt.err (!%p1986_p8)
}
  0x86   : > { %s1990_s19 = scalar_lea.vmem %s416_s20, 16  ;;  %s1997_s1 = scalar_lea.vmem %s416_s20, 32 }
  0x87   : > { %p1991_p12 = scmp.ne.s32.totalorder %s416_s20, %s1990_s19  ;;  %p1998_p9 = scmp.lt.s32.totalorder %s416_s20, %s416_s20 }
  0x88   : > { %p1999_p2 = scmp.lt.s32.totalorder %s1997_s1, %s1990_s19 }
  0x89   : > { %p1993_p0 = pnand %p1991_p12, %p2833_p11 }
  0x8a   : > { %p2000_p4 = por %p1999_p2, %p1998_p9 }
  0x8b   : > { %p1994_p5 = pneg %p1993_p0 }
  0x8d   : > { %p2001_p7 = pnand %p2000_p4, %p1994_p5 }
  0x8f   : > { %2004 = shalt.err (!%p2001_p7)
}
  0x90   : > { %1778 = dma.hbm_to_vmem [thread:$0]  (!%p2834_p1), %s2774_s8, 16, %s416_s20, [#allocation13]  }
  0x91   : > { %s2485_s14 = scalar_lea.hbm %s2766_s0, %s2390_s21  ;;  %s436_s18 = scalar_lea.vmem [#allocation3], %s2387_s15 }
  0x92   : > { %s444_s26 = sshll.u32 %s436_s18, 4  ;;  %s2837_s16 = sand.u32 1, %s2179_s23   ;;  %s445_s26 = int_to_ptr.vmem [resolvable:$true] %s444_s26 }
  0x93   : > { %s433_s28 = scalar_lea.sflag [#allocation4], %s2837_s16  ;;  %s2005_s17 = scalar_lea.hbm %s2485_s14, 64 }
  0x94   : > { %p2006_p7 = scmp.ne.s32.totalorder %s2485_s14, %s2005_s17  ;;  %p2838_p11 = scmp.ne.s32.totalorder %s2832_s3, 0 }
  0x95   : > { %s2010_s10 = scalar_lea.hbm %s2766_s0, 128  ;;  %p2011_p1 = scmp.lt.u32.totalorder %s2485_s14, %s2766_s0 }
  0x96   : > { %p2008_p3 = pnand %p2006_p7, %p2838_p11  ;;  %p2012_p10 = scmp.lt.u32.totalorder %s2010_s10, %s2005_s17 }
  0x97   : > { %p2014_p8 = scmp.lt.u32.totalorder %s2005_s17, %s2485_s14 }
  0x98   : > { %p2009_p13 = pneg %p2008_p3  ;;  %p2013_p6 = por %p2012_p10, %p2011_p1 }
  0x9a   : > { %p2015_p12 = por %p2014_p8, %p2013_p6 }
  0x9c   : > { %p2016_p0 = pnand %p2015_p12, %p2009_p13 }
  0x9e   : > { %2019 = shalt.err (!%p2016_p0)
}
  0x9f   : > { %s2020_s1 = scalar_lea.vmem %s445_s26, 64  ;;  %s2199_s9 = smov [#allocation3]  }
  0xa0   : > { %p2021_p5 = scmp.ne.s32.totalorder %s445_s26, %s2020_s1  ;;  %s2025_s25 = sshll.u32 %s2199_s9, 4  ;;  %s2026_s25 = int_to_ptr.vmem [resolvable:$false] %s2025_s25 }
  0xa1   : > { %s2027_s4 = scalar_lea.vmem %s2026_s25, 128  ;;  %p2028_p4 = scmp.lt.s32.totalorder %s445_s26, %s2026_s25 }
  0xa2   : > { %p2023_p9 = pnand %p2021_p5, %p2838_p11  ;;  %p2029_p7 = scmp.lt.s32.totalorder %s2027_s4, %s2020_s1 }
  0xa4   : > { %p2024_p2 = pneg %p2023_p9  ;;  %p2030_p3 = por %p2029_p7, %p2028_p4 }
  0xa6   : > { %p2031_p1 = pnand %p2030_p3, %p2024_p2 }
  0xa8   : > { %2034 = shalt.err (!%p2031_p1)
}
  0xa9   : > { %p2839_p10 = scmp.ne.s32.totalorder %s2830_s30, 0  ;;  %s2511_s16 = scalar_lea.hbm %s2768_s2, %s2390_s21 }
  0xaa   : > { %s473_s17 = scalar_lea.vmem [#allocation8], %s2387_s15  ;;  %s2035_s11 = scalar_lea.hbm %s2511_s16, 64 }
  0xab   : > { %1782 = dma.hbm_to_vmem [thread:$0]  (!%p2839_p10), %s2485_s14, 64, %s445_s26, %s433_s28  }
  0xac   : > { %s480_s20 = sshll.u32 %s473_s17, 4  ;;  %p2036_p13 = scmp.ne.s32.totalorder %s2511_s16, %s2035_s11  ;;  %s481_s20 = int_to_ptr.vmem [resolvable:$true] %s480_s20 }
  0xad   : > { %s2040_s14 = scalar_lea.hbm %s2768_s2, 128  ;;  %p2041_p12 = scmp.lt.u32.totalorder %s2511_s16, %s2768_s2 }
  0xae   : > { %p2038_p6 = pnand %p2036_p13, %p2838_p11  ;;  %p2042_p0 = scmp.lt.u32.totalorder %s2040_s14, %s2035_s11 }
  0xaf   : > { %p2044_p9 = scmp.lt.u32.totalorder %s2035_s11, %s2511_s16 }
  0xb0   : > { %p2039_p8 = pneg %p2038_p6  ;;  %p2043_p5 = por %p2042_p0, %p2041_p12 }
  0xb2   : > { %p2045_p2 = por %p2044_p9, %p2043_p5 }
  0xb4   : > { %p2046_p4 = pnand %p2045_p2, %p2039_p8 }
  0xb6   : > { %2049 = shalt.err (!%p2046_p4)
}
  0xb7   : > { %s2050_s15 = scalar_lea.vmem %s481_s20, 64  ;;  %s2200_s21 = smov [#allocation8]  }
  0xb8   : > { %p2051_p7 = scmp.ne.s32.totalorder %s481_s20, %s2050_s15  ;;  %s2055_s19 = sshll.u32 %s2200_s21, 4  ;;  %s2056_s19 = int_to_ptr.vmem [resolvable:$false] %s2055_s19 }
  0xb9   : > { %s2057_s1 = scalar_lea.vmem %s2056_s19, 128  ;;  %p2058_p13 = scmp.lt.s32.totalorder %s481_s20, %s2056_s19 }
  0xba   : > { %p2053_p3 = pnand %p2051_p7, %p2838_p11  ;;  %p2059_p6 = scmp.lt.s32.totalorder %s2057_s1, %s2050_s15 }
  0xbc   : > { %p2054_p1 = pneg %p2053_p3  ;;  %p2060_p10 = por %p2059_p6, %p2058_p13 }
  0xbe   : > { %p2061_p0 = pnand %p2060_p10, %p2054_p1 }
  0xc0   : > { %2064 = shalt.err (!%p2061_p0)
}
  0xc1   : > { %p2840_p12 = scmp.ne.s32.totalorder %s2830_s30, 0  ;;  %p2841_p8 = scmp.ne.s32.totalorder %s2821_s13, 0 }
  0xc2   : > { %s2535_s3 = sand.u32 (!%p2841_p8), 1, %s2175_s22   ;;  %p2842_p11 = scmp.ne.s32.totalorder (!%p2841_p8), %s2818_s29, 0 }
  0xc3   : > { %1788 = dma.hbm_to_vmem [thread:$0]  (!%p2840_p12), %s2511_s16, 64, %s481_s20, %s2411_s12  }
  0xc4   : > { %489 = sbr.rel (%p2841_p8) target bundleno = 1676 (0x68c), region = 64  ;;  %s2538_s9 = sshll.u32 (!%p2841_p8), %s2535_s3, 2 }
  0xc5   : > { %s492_s25 = scalar_lea.sflag (!%p2841_p8), [#allocation4], %s2535_s3  ;;  %s495_s4 = scalar_lea.vmem (!%p2841_p8), [#allocation3], %s2538_s9 }
  0xcb   : > { %2146 = dma.done.wait (%p2842_p11), %s492_s25, 64  }
  0xcc   : > { %2148 = vsyncadd (%p2842_p11), %s492_s25, 4294967232  ;;  %s500_s12 = sand.u32 1, %s2309_s27   ;;  %s504_s30 = scalar_lea.vmem [#allocation6], %s2538_s9 }
  0xcd   : > { %s501_s13 = scalar_lea.sflag [#allocation7], %s500_s12 }
  0xce   : > { %2150 = dma.done.wait (%p2842_p11), %s501_s13, 128  }
  0xcf   : > { %2152 = vsyncadd (%p2842_p11), %s501_s13, 4294967168  ;;  %s513_s6 = scalar_lea.vmem [#allocation8], %s2538_s9  ;;  %p2843_p10 = scmp.eq.s32.totalorder %s2309_s27, 0 }
  0xd1   : > { %2154 = dma.done.wait (%p2843_p10), [#allocation10], 512   ;;  %p2844_p5 = pmov %p2843_p10 }
  0xd3   : > { %2156 = vsyncadd (%p2844_p5), [#allocation10], 4294966784  ;;  %p2845_p9 = pmov %p2844_p5 }
  0xd4   : > { %p2846_p2 = pmov %p2844_p5 }
  0xd5   : > { %2158 = dma.done.wait (%p2845_p9), [#allocation13], 16  }
  0xd6   : > { %2160 = vsyncadd (%p2846_p2), [#allocation13], 4294967280  ;;  %vm613_vm0 = vcmask 261120   ;;  %v2201_v0 = vmov 0.0   ;;  %vm2202_vm1 = vmmov 0   ;;  %v1867_v1 = vld [vmem:[%s2771_s5] sm:$0xff]  }
  0xd7   : > { %1675 = vmatprep.subr.bf16.mxu1 %v2201_v0  ;;  %1667 = vmatprep.subr.bf16.mxu0 %v2201_v0  ;;  %1326 = vst.msk [vmem:[#allocation2] sm:$0xff] %vm613_vm0, %v2201_v0  ;;  %v1868_v2 = vld [vmem:[#allocation9] sm:$0xff]   ;;  %v1869_v3 = vld [vmem:[%s2771_s5 + $0x8] sm:$0xff]   ;;  %v584_v4 = vld [vmem:[%s504_s30] sm:$0xf]  ;;  %s2847_s11 = sld [smem:[#allocation34_spill]] }
  0xd8   : > { %1679 = vmatprep.mubr.msk.bf16.mxu1 %vm2202_vm1, %v2201_v0  ;;  %1671 = vmatprep.mubr.msk.bf16.mxu0 %vm2202_vm1, %v2201_v0  ;;  %v1870_v5 = vld [vmem:[#allocation9 + $0x8] sm:$0xff]   ;;  %s2848_s14 = sld [smem:[#allocation33_spill]]  ;;  %vm797_vm2 = vcmask 64512   ;;  %s2203_s26 = smov 112   ;;  %v1871_v22 = vld [vmem:[#allocation11] sm:$0xff]   ;;  %v1872_v23 = vld [vmem:[#allocation11 + $0x8] sm:$0xff]  }
  0xd9   : > { %1676 = vmatpush3.bf16.msra.mxu1 %v1867_v1  ;;  %1668 = vmatpush3.bf16.msra.mxu0 %v1868_v2  ;;  %v583_v6 = vld [vmem:[%s495_s4] sm:$0xf]  ;;  %s2204_s28 = smov 120   ;;  %s2205_s15 = smov 104   ;;  %v585_v24 = vld [vmem:[%s513_s6] sm:$0xf] }
  0xda   : > { %1677 = vmatprep.subr.bf16.mxu1 %v2201_v0  ;;  %1669 = vmatprep.subr.bf16.mxu0 %v2201_v0  ;;  %v1612_v39 = vld [vmem:[#allocation12] ss:$0 sm:$0xff]  ;;  %vm862_vm3 = vcmask 1043456   ;;  %s1603_s21 = sshll.u32 %s2535_s3, 4  ;;  %vm856_vm4 = vcmask 60416   ;;  %s2849_s25 = sld [smem:[#allocation35_spill]] }
  0xdb   : > { %s2641_s19 = scalar_lea.vmem [#allocation15], %s1603_s21  ;;  %s2206_s12 = smov 8   ;;  %vm1258_vm5 = vcmask 130048   ;;  %vm1260_vm6 = vcmask 195584  }
  0xdc   : > { %s2207_s6 = smov 16   ;;  %s2851_s29 = sld [smem:[#allocation24_spill]] }
  0xdd   : > { %1678 = vmatpush3.bf16.msra.mxu1 %v1869_v3  ;;  %1670 = vmatpush3.bf16.msra.mxu0 %v1870_v5  ;;  %v1608_v7 = vld [vmem:[%s2847_s11] ss:$0 sm:$0xff]  ;;  %s2208_s27 = smov 24   ;;  %s2852_s18 = sld [smem:[#allocation29_spill]] }
  0xde   : > { %1691 = vmatprep.subr.bf16.mxu1 %v2201_v0  ;;  %1683 = vmatprep.subr.bf16.mxu0 %v2201_v0  ;;  %v1604_v8 = vld [vmem:[%s2848_s14] ss:$0 sm:$0xff]  ;;  %s1379_s17 = sshll.u32 %s2641_s19, 4  ;;  %s2853_s10 = sld [smem:[#allocation38_spill]]  ;;  %s2681_s17 = int_to_ptr.vmem [resolvable:$true] %s1379_s17 }
  0xdf   : > { %s1349_s14 = scalar_lea.sflag [#allocation16], %s2535_s3 }
  0xe0   : > { %1680 = vmatmul.mubr.msk.bf16.vlgmr.msra.gmra.mrb[0].mxu1 %vm613_vm0, %v584_v4  ;;  %1672 = vmatmul.mubr.msk.bf16.vlgmr.msra.gmra.mrb[0].mxu0 %vm613_vm0, %v583_v6  ;;  %s2850_s4 = smov %s2849_s25 }
  0xe1   : > { %1693 = vmatprep.mubr.msk.bf16.mxu1 %vm2202_vm1, %v2201_v0  ;;  %1687 = vmatprep.mubr.msk.bf16.mxu0 %vm2202_vm1, %v2201_v0 }
  0xe2   : > { %1684 = vmatpush3.bf16.msra.mxu0 %v1871_v22  ;;  %s1638_s16 = sshll.u32 %s2851_s29, 8 }
  0xe3   : > { %1685 = vmatprep.subr.bf16.mxu0 %v2201_v0  ;;  %p2854_p7 = scmp.ne.s32.totalorder %s2852_s18, 0 }
  0xe4   : > { %s2679_s24 = scalar_lea.hbm %s2853_s10, %s1638_s16 }
  0xe6   : > { %1686 = vmatpush3.bf16.msra.mxu0 %v1872_v23 }
  0xe7   : > { %1697 = vmatprep.subr.bf16.mxu0 %v2201_v0 }
  0xe9   : > { %1688 = vmatmul.mubr.msk.bf16.vlgmr.msra.gmra.mrb[4].mxu0 %vm613_vm0, %v585_v24 }
  0xea   : > { %1699 = vmatprep.mubr.msk.bf16.mxu0 %vm2202_vm1, %v2201_v0 }
 0x1b3   : > { %v720_v9 = vpop.f32.mrb[0].mxu1  ;;  %v651_v12 = vpop.f32.mrb[0].mxu0 }
 0x1b4   : > { %v721_v10 = vadd.f32 %v1608_v7, %v720_v9  ;;  %v1681_v11 = vpop.f32.mrb[1].mxu1  ;;  %v652_v14 = vadd.f32 %v1604_v8, %v651_v12  ;;  %v1673_v15 = vpop.f32.mrb[1].mxu0 }
 0x1b5   : > { %v723_v13 = vpop.f32.mrb[2].mxu1  ;;  %v654_v18 = vpop.f32.mrb[2].mxu0 }
 0x1b6   : > { %v796_v16 = vpack.c.bf16 %v721_v10, %v721_v10  ;;  %v1682_v17 = vpop.f32.mrb[3].mxu1  ;;  %v1674_v19 = vpop.f32.mrb[3].mxu0  ;;  %v795_v20 = vpack.c.bf16 %v652_v14, %v652_v14 }
 0x1b8   : > { %1023 = vrot.lane.b32.xlu1 %v796_v16, %s2203_s26  ;;  %910 = vrot.lane.b32.xlu0 %v796_v16, %s2204_s28  ;;  %v802_v21 = vsel %vm797_vm2, %v796_v16, 0 }
 0x1b9   : > { %1692 = vmatpush3.bf16.xpose.msra.mxu1 %v802_v21 }
 0x1ba   : > { %1703 = vmatprep.subr.bf16.mxu1 %v2201_v0 }
 0x1bc   : > { %1021 = vrot.lane.b32.xlu1 %v795_v20, %s2203_s26  ;;  %907 = vrot.lane.b32.xlu0 %v795_v20, %s2204_s28  ;;  %v789_v40 = vpop.f32.mrb[4].mxu0 }
 0x1bd   : > { %v790_v41 = vadd.f32 %v1612_v39, %v789_v40  ;;  %v1689_v42 = vpop.f32.mrb[5].mxu0 }
 0x1be   : > { %v792_v43 = vpop.f32.mrb[6].mxu0 }
 0x1bf   : > { %v858_v44 = vpack.c.bf16 %v790_v41, %v790_v41  ;;  %v1690_v45 = vpop.f32.mrb[7].mxu0 }
 0x1c0   : > { %1133 = vrot.lane.b32.xlu1 %v795_v20, %s2205_s15  ;;  %1135 = vrot.lane.b32.xlu0 %v796_v16, %s2205_s15  ;;  %v1873_v45 = vld [vmem:[%s2849_s25] sm:$0xff]  }
 0x1c1   : > { %1694 = vmatmul.mubr.msk.bf16.vlgmr.msra.gmra.mrb[4].mxu1 %vm797_vm2, %v795_v20  ;;  %v864_v46 = vsel %vm862_vm3, %v858_v44, 0 }
 0x1c2   : > { %1705 = vmatprep.mubr.msk.bf16.mxu1 %vm2202_vm1, %v2201_v0  ;;  %1698 = vmatpush3.bf16.msra.mxu0 %v864_v46 }
 0x1c3   : > { %1709 = vmatprep.subr.bf16.mxu0 %v2201_v0 }
 0x22a   : > { %v911_v25 = vpop.permute.xlu0 %910  ;;  %v1024_v27 = vpop.permute.xlu1 %1023 }
 0x22b   : > { %v916_v26 = vsel %vm797_vm2, %v911_v25, 0  ;;  %v1029_v29 = vsel %vm797_vm2, %v1024_v27, 0 }
 0x22c   : > { %1704 = vmatpush3.bf16.xpose.msra.mxu1 %v916_v26 }
 0x22d   : > { %1715 = vmatprep.subr.bf16.mxu1 %v2201_v0 }
 0x22e   : > { %v908_v28 = vpop.permute.xlu0 %907  ;;  %v1022_v31 = vpop.permute.xlu1 %1021 }
 0x232   : > { %v1136_v30 = vpop.permute.xlu0 %1135  ;;  %v1134_v33 = vpop.permute.xlu1 %1133 }
 0x233   : > { %1706 = vmatmul.mubr.msk.bf16.vlgmr.msra.gmra.mrb[8].mxu1 %vm797_vm2, %v908_v28  ;;  %v1141_v32 = vsel %vm797_vm2, %v1136_v30, 0 }
 0x234   : > { %1716 = vmatpush3.bf16.xpose.msra.mxu1 %v1029_v29  ;;  %1717 = vmatprep.mubr.msk.bf16.mxu1 %vm2202_vm1, %v2201_v0 }
 0x235   : > { %1727 = vmatprep.subr.bf16.mxu1 %v2201_v0 }
 0x23b   : > { %1718 = vmatmul.mubr.msk.bf16.vlgmr.msra.gmra.mrb[12].mxu1 %vm797_vm2, %v1022_v31 }
 0x23c   : > { %1728 = vmatpush3.bf16.xpose.msra.mxu1 %v1141_v32  ;;  %1729 = vmatprep.mubr.msk.bf16.mxu1 %vm2202_vm1, %v2201_v0 }
 0x23d   : > { %1739 = vmatprep.subr.bf16.mxu1 %v2201_v0 }
 0x243   : > { %1730 = vmatmul.mubr.msk.bf16.vlgmr.msra.gmra.mrb[16].mxu1 %vm797_vm2, %v1134_v33 }
 0x244   : > { %1743 = vmatprep.mubr.msk.bf16.mxu1 %vm2202_vm1, %v2201_v0  ;;  %1740 = vmatpush3.bf16.msra.mxu1 %v1873_v45 }
 0x245   : > { %1741 = vmatprep.subr.bf16.mxu1 %v2201_v0 }
 0x294   : > { %v838_v34 = vpop.f32.mrb[4].mxu1 }
 0x295   : > { %v1695_v35 = vpop.f32.mrb[5].mxu1  ;;  %v844_v36 = vsel %vm797_vm2, %v838_v34, -inf }
 0x296   : > { %845 = vmax.xlane.f32.xlu0 %v844_v36  ;;  %v841_v37 = vpop.f32.mrb[6].mxu1 }
 0x297   : > { %v1696_v38 = vpop.f32.mrb[7].mxu1 }
 0x306   : > { %v952_v47 = vpop.f32.mrb[8].mxu1 }
 0x307   : > { %v1707_v48 = vpop.f32.mrb[9].mxu1  ;;  %v958_v49 = vsel %vm797_vm2, %v952_v47, -inf }
 0x308   : > { %959 = vmax.xlane.f32.xlu1 %v958_v49  ;;  %v955_v50 = vpop.f32.mrb[10].mxu1 }
 0x309   : > { %v1708_v51 = vpop.f32.mrb[11].mxu1  ;;  %v1874_v50 = vld [vmem:[%s2850_s4 + $0x8] sm:$0xff]  }
 0x30a   : > { %1742 = vmatpush3.bf16.msra.mxu1 %v1874_v50 }
 0x30e   : > { %v1065_v52 = vpop.f32.mrb[12].mxu1 }
 0x30f   : > { %v1719_v53 = vpop.f32.mrb[13].mxu1  ;;  %v1071_v54 = vsel %vm797_vm2, %v1065_v52, -inf }
 0x310   : > { %1072 = vmax.xlane.f32.xlu0 %v1071_v54  ;;  %v1068_v55 = vpop.f32.mrb[14].mxu1 }
 0x311   : > { %v1720_v56 = vpop.f32.mrb[15].mxu1 }
 0x316   : > { %v1177_v57 = vpop.f32.mrb[16].mxu1 }
 0x317   : > { %v1731_v58 = vpop.f32.mrb[17].mxu1  ;;  %v1183_v59 = vsel %vm797_vm2, %v1177_v57, -inf }
 0x318   : > { %1184 = vmax.xlane.f32.xlu0 %v1183_v59  ;;  %v1180_v60 = vpop.f32.mrb[18].mxu1 }
 0x319   : > { %v1732_v61 = vpop.f32.mrb[19].mxu1 }
 0x323   : > { %v846_v62 = vpop.xlane.xlu0 %845 }
 0x324   : > { %v847_v63 = vsub.f32 %v838_v34, %v846_v62 }
 0x326   : > { %v848_v1 = vmul.f32 1.442695, %v847_v63 }
 0x328   : > { %1875 = vpow2.f32 %v848_v1 }
 0x332   : > { %v1876_v2 = vpop.eup %1875 }
 0x333   : > { %v850_v3 = vsel %vm797_vm2, %v1876_v2, 0.0 }
 0x334   : > { %851 = vadd.xlane.f32.xlu1 %v850_v3 }
 0x345   : > { %973 = vrot.lane.b32.xlu1 %v858_v44, %s2204_s28  ;;  %s2209_s28 = smov [#allocation15]  }
 0x395   : > { %v960_v4 = vpop.xlane.xlu1 %959 }
 0x396   : > { %v961_v5 = vsub.f32 %v952_v47, %v960_v4 }
 0x398   : > { %v962_v6 = vmul.f32 1.442695, %v961_v5 }
 0x39a   : > { %1877 = vpow2.f32 %v962_v6 }
 0x39d   : > { %v1073_v7 = vpop.xlane.xlu0 %1072 }
 0x39e   : > { %v1074_v8 = vsub.f32 %v1065_v52, %v1073_v7 }
 0x3a0   : > { %v1075_v9 = vmul.f32 1.442695, %v1074_v8 }
 0x3a2   : > { %1879 = vpow2.f32 %v1075_v9 }
 0x3a4   : > { %v1878_v10 = vpop.eup %1877 }
 0x3a5   : > { %v1185_v11 = vpop.xlane.xlu0 %1184  ;;  %v964_v12 = vsel %vm797_vm2, %v1878_v10, 0.0 }
 0x3a6   : > { %v1186_v13 = vsub.f32 %v1177_v57, %v1185_v11  ;;  %965 = vadd.xlane.f32.xlu0 %v964_v12 }
 0x3a8   : > { %v1187_v14 = vmul.f32 1.442695, %v1186_v13 }
 0x3aa   : > { %1881 = vpow2.f32 %v1187_v14 }
 0x3ac   : > { %v1880_v15 = vpop.eup %1879 }
 0x3ad   : > { %v1077_v16 = vsel %vm797_vm2, %v1880_v15, 0.0 }
 0x3ae   : > { %1078 = vadd.xlane.f32.xlu1 %v1077_v16 }
 0x3b4   : > { %v1882_v17 = vpop.eup %1881 }
 0x3b5   : > { %v1189_v18 = vsel %vm797_vm2, %v1882_v17, 0.0 }
 0x3b6   : > { %1190 = vadd.xlane.f32.xlu0 %v1189_v18 }
 0x3bf   : > { %1197 = vrot.lane.b32.xlu1 %v858_v44, %s2205_s15  ;;  %s2069_s15 = sshll.u32 %s2209_s28, 4  ;;  %s2070_s15 = int_to_ptr.vmem [resolvable:$false] %s2069_s15 }
 0x3c0   : > { %s2071_s21 = scalar_lea.vmem %s2070_s15, 512  ;;  %p2072_p13 = scmp.lt.s32.totalorder %s2681_s17, %s2070_s15 }
 0x3c1   : > { %v852_v19 = vpop.xlane.xlu1 %851 }
 0x3c2   : > { %1883 = vrcp.f32 %v852_v19 }
 0x3c5   : > { %v974_v21 = vpop.permute.xlu1 %973 }
 0x3c6   : > { %v979_v24 = vsel %vm862_vm3, %v974_v21, 0 }
 0x3cc   : > { %v1884_v20 = vpop.eup %1883  ;;  %1085 = vrot.lane.b32.xlu0 %v858_v44, %s2203_s26  ;;  %s2065_s26 = scalar_lea.vmem %s2681_s17, 256 }
 0x3cd   : > { %v854_v22 = vmul.f32 %v1884_v20, %v1876_v2  ;;  %p2066_p4 = scmp.ne.s32.totalorder %s2681_s17, %s2065_s26  ;;  %p2073_p6 = scmp.lt.s32.totalorder %s2071_s21, %s2065_s26 }
 0x3cf   : > { %v855_v23 = vpack.c.bf16 %v854_v22, %v854_v22  ;;  %p2067_p3 = pnand %p2066_p4, %p2854_p7  ;;  %p2074_p0 = por %p2073_p6, %p2072_p13 }
 0x3d1   : > { %857 = vst.msk [vmem:[%s2641_s19] sm:$0xf] %vm856_vm4, %v855_v23  ;;  %1700 = vmatmul.mubr.msk.bf16.vlgmr.msra.gmra.mrb[8].mxu0 %vm797_vm2, %v855_v23  ;;  %p2068_p1 = pneg %p2067_p3 }
 0x3d2   : > { %1710 = vmatpush3.bf16.msra.mxu0 %v979_v24  ;;  %1711 = vmatprep.mubr.msk.bf16.mxu0 %vm2202_vm1, %v2201_v0 }
 0x3d3   : > { %1721 = vmatprep.subr.bf16.mxu0 %v2201_v0  ;;  %p2075_p12 = pnand %p2074_p0, %p2068_p1 }
 0x433   : > { %v966_v25 = vpop.xlane.xlu0 %965 }
 0x434   : > { %1885 = vrcp.f32 %v966_v25 }
 0x43b   : > { %v1079_v26 = vpop.xlane.xlu1 %1078 }
 0x43c   : > { %1887 = vrcp.f32 %v1079_v26 }
 0x43e   : > { %v1886_v27 = vpop.eup %1885 }
 0x43f   : > { %v968_v28 = vmul.f32 %v1886_v27, %v1878_v10  ;;  %v1198_v35 = vpop.permute.xlu1 %1197 }
 0x440   : > { %v1203_v37 = vsel %vm862_vm3, %v1198_v35, 0 }
 0x441   : > { %v969_v29 = vpack.c.bf16 %v968_v28, %v968_v28 }
 0x443   : > { %v1191_v30 = vpop.xlane.xlu0 %1190  ;;  %1619 = vst.msk [vmem:[%s2641_s19 + $0x4] sm:$0xf] %vm856_vm4, %v969_v29  ;;  %1712 = vmatmul.mubr.msk.bf16.vlgmr.msra.gmra.mrb[12].mxu0 %vm797_vm2, %v969_v29 }
 0x444   : > { %1889 = vrcp.f32 %v1191_v30  ;;  %1723 = vmatprep.mubr.msk.bf16.mxu0 %vm2202_vm1, %v2201_v0 }
 0x446   : > { %v1888_v31 = vpop.eup %1887 }
 0x447   : > { %v1081_v32 = vmul.f32 %v1888_v31, %v1880_v15  ;;  %v1086_v33 = vpop.permute.xlu0 %1085 }
 0x448   : > { %v1091_v34 = vsel %vm862_vm3, %v1086_v33, 0 }
 0x449   : > { %1722 = vmatpush3.bf16.msra.mxu0 %v1091_v34  ;;  %v1082_v36 = vpack.c.bf16 %v1081_v32, %v1081_v32 }
 0x44a   : > { %1733 = vmatprep.subr.bf16.mxu0 %v2201_v0 }
 0x44b   : > { %1622 = vst.msk [vmem:[%s2641_s19 + $0x8] sm:$0xf] %vm856_vm4, %v1082_v36 }
 0x44c   : > { %1724 = vmatmul.mubr.msk.bf16.vlgmr.msra.gmra.mrb[16].mxu0 %vm797_vm2, %v1082_v36 }
 0x44d   : > { %1734 = vmatpush3.bf16.msra.mxu0 %v1203_v37  ;;  %1735 = vmatprep.mubr.msk.bf16.mxu0 %vm2202_vm1, %v2201_v0 }
 0x44e   : > { %v1890_v38 = vpop.eup %1889 }
 0x44f   : > { %v1193_v39 = vmul.f32 %v1890_v38, %v1882_v17 }
 0x451   : > { %v1194_v40 = vpack.c.bf16 %v1193_v39, %v1193_v39 }
 0x453   : > { %1625 = vst.msk [vmem:[%s2641_s19 + $0xc] sm:$0xf] %vm856_vm4, %v1194_v40 }
 0x454   : > { %1736 = vmatmul.mubr.msk.bf16.vlgmr.msra.gmra.mrb[20].mxu0 %vm797_vm2, %v1194_v40 }
 0x4a4   : > { %v900_v41 = vpop.f32.mrb[8].mxu0 }
 0x4a5   : > { %v1701_v42 = vpop.f32.mrb[9].mxu0 }
 0x4a6   : > { %v903_v43 = vpop.f32.mrb[10].mxu0 }
 0x4a7   : > { %v1702_v44 = vpop.f32.mrb[11].mxu0 }
 0x516   : > { %v1015_v46 = vpop.f32.mrb[12].mxu0 }
 0x517   : > { %1246 = vrot.lane.b32.xlu1 %v1015_v46, %s2206_s12  ;;  %v1713_v47 = vpop.f32.mrb[13].mxu0 }
 0x518   : > { %v1018_v48 = vpop.f32.mrb[14].mxu0 }
 0x519   : > { %v1714_v49 = vpop.f32.mrb[15].mxu0 }
 0x51f   : > { %v1127_v51 = vpop.f32.mrb[16].mxu0 }
 0x520   : > { %1250 = vrot.lane.b32.xlu0 %v1127_v51, %s2207_s6  ;;  %v1725_v52 = vpop.f32.mrb[17].mxu0 }
 0x521   : > { %v1130_v53 = vpop.f32.mrb[18].mxu0 }
 0x522   : > { %v1726_v54 = vpop.f32.mrb[19].mxu0 }
 0x527   : > { %v1239_v55 = vpop.f32.mrb[20].mxu0 }
 0x528   : > { %1254 = vrot.lane.b32.xlu1 %v1239_v55, %s2208_s27  ;;  %v1737_v0 = vpop.f32.mrb[21].mxu0 }
 0x529   : > { %v1242_v56 = vpop.f32.mrb[22].mxu0 }
 0x52a   : > { %v1738_v57 = vpop.f32.mrb[23].mxu0 }
 0x589   : > { %v1247_v58 = vpop.permute.xlu1 %1246 }
 0x58a   : > { %v1257_v60 = vsel %vm797_vm2, %v900_v41, %v1247_v58 }
 0x592   : > { %v1251_v59 = vpop.permute.xlu0 %1250 }
 0x593   : > { %v1259_v61 = vsel %vm1258_vm5, %v1257_v60, %v1251_v59 }
 0x59a   : > { %v1255_v62 = vpop.permute.xlu1 %1254 }
 0x59b   : > { %v1261_v63 = vsel %vm1260_vm6, %v1259_v61, %v1255_v62 }
 0x59c   : > { %v1266_v1 = vpack.c.bf16 %v1261_v63, %v1261_v63 }
 0x59e   : > { %1744 = vmatmul.mubr.msk.bf16.vlgmr.msra.gmra.mrb[20].mxu1 %vm613_vm0, %v1266_v1 }
 0x59f   : > { %2078 = shalt.err (!%p2075_p12)
}
 0x5a0   : > { %s2079_s19 = scalar_lea.hbm %s2679_s24, 256  ;;  %s2083_s25 = scalar_lea.hbm %s2853_s10, 512 }
 0x5a1   : > { %p2080_p8 = scmp.ne.s32.totalorder %s2679_s24, %s2079_s19  ;;  %p2084_p5 = scmp.lt.u32.totalorder %s2679_s24, %s2853_s10 }
 0x5a2   : > { %p2085_p9 = scmp.lt.u32.totalorder %s2083_s25, %s2079_s19  ;;  %p2087_p4 = scmp.lt.u32.totalorder %s2079_s19, %s2679_s24 }
 0x5a3   : > { %p2081_p11 = pnand %p2080_p8, %p2854_p7 }
 0x5a4   : > { %p2086_p2 = por %p2085_p9, %p2084_p5 }
 0x5a5   : > { %p2082_p10 = pneg %p2081_p11 }
 0x5a6   : > { %p2088_p3 = por %p2087_p4, %p2086_p2 }
 0x5a8   : > { %p2089_p1 = pnand %p2088_p3, %p2082_p10 }
 0x5aa   : > { %2092 = shalt.err (!%p2089_p1)
}
 0x5ab   : > { %s2210_s30 = smov 64   ;;  %s2211_s6 = smov 4   ;;  %v1327_v2 = vld [vmem:[#allocation2] sm:$0xff] }
 0x5ac   : > { %1766 = dma.vmem_to_hbm [thread:$0]  (%p2854_p7), %s2681_s17, 256, %s2679_s24, %s1349_s14, %s2210_s30, %s2210_s30, %s2211_s6  }
 0x5ad   : > { %s1602_s27 = sshll.u32 %s2535_s3, 3  ;;  %s2855_s11 = sld [smem:[#allocation36_spill]] }
 0x5ae   : > { %s1633_s26 = sshll.u32 %s2851_s29, 7  ;;  %s573_s28 = scalar_lea.vmem [#allocation14], %s1602_s27 }
 0x5af   : > { %s1363_s15 = sshll.u32 %s573_s28, 4  ;;  %s2856_s14 = sld [smem:[#allocation37_spill]]  ;;  %s2718_s15 = int_to_ptr.vmem [resolvable:$true] %s1363_s15 }
 0x5b0   : > { %s1344_s19 = scalar_lea.sflag [#allocation5], %s2535_s3  ;;  %s2093_s1 = scalar_lea.vmem %s2718_s15, 128 }
 0x5b1   : > { %p2094_p13 = scmp.ne.s32.totalorder %s2718_s15, %s2093_s1  ;;  %s2212_s29 = smov [#allocation14]  }
 0x5b2   : > { %s2097_s9 = sshll.u32 %s2212_s29, 4  ;;  %s2098_s9 = int_to_ptr.vmem [resolvable:$false] %s2097_s9 }
 0x5b3   : > { %v1630_v8 = vld [vmem:[%s2855_s11] ss:$0 sm:$0xff]  ;;  %p2095_p6 = pnand %p2094_p13, %p2854_p7  ;;  %s2099_s25 = scalar_lea.vmem %s2098_s9, 256 }
 0x5b4   : > { %p2100_p12 = scmp.lt.s32.totalorder %s2718_s15, %s2098_s9  ;;  %p2101_p8 = scmp.lt.s32.totalorder %s2099_s25, %s2093_s1 }
 0x5b5   : > { %s2716_s21 = scalar_lea.hbm %s2856_s14, %s1633_s26  ;;  %p2096_p0 = pneg %p2095_p6 }
 0x5b6   : > { %p2102_p11 = por %p2101_p8, %p2100_p12 }
 0x5b8   : > { %p2103_p10 = pnand %p2102_p11, %p2096_p0 }
 0x671   : > { %v1316_v3 = vpop.f32.mrb[20].mxu1 }
 0x672   : > { %v1328_v4 = vadd.f32 %v1327_v2, %v1316_v3  ;;  %v1745_v5 = vpop.f32.mrb[21].mxu1 }
 0x673   : > { %v1319_v6 = vpop.f32.mrb[22].mxu1 }
 0x674   : > { %1329 = vst.msk [vmem:[#allocation2] sm:$0xff] %vm613_vm0, %v1328_v4  ;;  %v1746_v7 = vpop.f32.mrb[23].mxu1 }
 0x67b   : > { %v1333_v9 = vld [vmem:[#allocation2] sm:$0xff] }
 0x67c   : > { %v1341_v10 = vadd.f32 %v1630_v8, %v1333_v9 }
 0x67e   : > { %1342 = vst.msk [vmem:[%s573_s28] sm:$0xff] %vm613_vm0, %v1341_v10 }
 0x67f   : > { %2106 = shalt.err (!%p2103_p10)
}
 0x680   : > { %s2107_s3 = scalar_lea.hbm %s2716_s21, 128  ;;  %s2111_s30 = scalar_lea.hbm %s2856_s14, 256 }
 0x681   : > { %p2108_p5 = scmp.ne.s32.totalorder %s2716_s21, %s2107_s3  ;;  %p2112_p4 = scmp.lt.u32.totalorder %s2716_s21, %s2856_s14 }
 0x682   : > { %p2113_p3 = scmp.lt.u32.totalorder %s2111_s30, %s2107_s3  ;;  %p2115_p13 = scmp.lt.u32.totalorder %s2107_s3, %s2716_s21 }
 0x683   : > { %p2109_p9 = pnand %p2108_p5, %p2854_p7 }
 0x684   : > { %p2114_p1 = por %p2113_p3, %p2112_p4 }
 0x685   : > { %p2110_p2 = pneg %p2109_p9 }
 0x686   : > { %p2116_p6 = por %p2115_p13, %p2114_p1 }
 0x688   : > { %p2117_p0 = pnand %p2116_p6, %p2110_p2 }
 0x68a   : > { %2120 = shalt.err (!%p2117_p0)
}
 0x68b   : > { %1765 = dma.vmem_to_hbm [thread:$0]  (%p2854_p7), %s2718_s15, 128, %s2716_s21, %s1344_s19  }
 0x68c PF: > { %s2857_s16 = sld [smem:[#allocation23_spill]]  ;;  %s2858_s20 = sld [smem:[#allocation27_spill]] }
 0x68d   : > { %s2859_s11 = sld [smem:[#allocation26_spill]] }
 0x692   : > { %s1394_s26 = sand.u32 1, %s2857_s16   ;;  %p2860_p12 = scmp.ne.s32.totalorder %s2858_s20, 0 }
 0x693   : > { %p2861_p8 = scmp.ge.s32.totalorder %s2859_s11, 2  ;;  %s1395_s28 = scalar_lea.sflag [#allocation5], %s1394_s26 }
 0x695   : > { %p1790_p11 = pnand %p2861_p8, %p2860_p12 }
 0x697   : > { %2162 = dma.done.wait (!%p1790_p11), %s1395_s28, 128  }
 0x698   : > { %2164 = vsyncadd (!%p1790_p11), %s1395_s28, 4294967168  ;;  %s1404_s17 = scalar_lea.sflag [#allocation16], %s1394_s26 }
 0x699   : > { %2166 = dma.done.wait (!%p1790_p11), %s1404_s17, 256  }
 0x69a   : > { %2168 = vsyncadd (!%p1790_p11), %s1404_s17, 4294967040  ;;  %s37_s26 = sadd.s32 1, %s2859_s11   ;;  %s2862_s18 = sld [smem:[#allocation30_spill]] }
 0x69b   : > { %p34_p10 = scmp.ge.s32.totalorder %s37_s26, 4   ;;  %s2863_s24 = sld [smem:[#allocation25_spill]] }
 0x69c   : > { %s2864_s25 = sld [smem:[#allocation28_spill]]  ;;  %s2865_s21 = smov %s2175_s22 }
 0x69d   : > { %s2866_s22 = smov %s2179_s23  ;;  %36 = sbr.rel (!%p34_p10) target bundleno = 21 (0x15), region = 179 }
 0x6a0   : > { %s2867_s23 = smov %s2862_s18 }
 0x6a4   :  { %1409 = vsyncpa [#allocation4], 1 }
 0x6a5   :  { %1411 = vsyncpa [#allocation4 + $0x1], 1 }
 0x6a6   :  { %1412 = vsyncpa [#allocation7], 1 }
 0x6a7   :  { %1414 = vsyncpa [#allocation7 + $0x1], 1 }
 0x6a8   :  { %1415 = vsyncpa [#allocation10], 1 }
 0x6a9   :  { %1416 = vsyncpa [#allocation13], 1 }
 0x6aa   :  { %1417 = vsyncpa [#allocation5], 1 }
 0x6ab   :  { %1419 = vsyncpa [#allocation5 + $0x1], 1 }
 0x6ac   :  { %1420 = vsyncpa [#allocation16], 1 }
 0x6ad   :  { %1422 = vsyncpa [#allocation16 + $0x1], 1 }

</bundles_post_ra>
